<compile_context>
chip_gen: v5e
topology: v5e:2x2
jax: 0.10.0
libtpu: 0.0.40
codegen_flags: <defaults>
</compile_context>

<pallas_src>
import functools
import math

import jax
import jax.numpy as jnp
import numpy as np
from jax.experimental import pallas as pl
from jax.experimental.pallas import tpu as pltpu


def deep_iqn_kernel(
    xs_ref,      # (TB, S+A)          state|action for this batch tile
    taus_ref,    # (TB*T, 1)
    as_ref,      # (TB*T, A+S)        torch-style interleaved [action_rep | state_rep]
    pis_ref,     # (1, n_cos)         pi * [1..n_cos]
    wxs_ref,     # (S+A, 3*Lp)        fused [head_w | ff1_xs | ff2_xs]
    bxs_ref,     # (1, 3*Lp)          fused [head_b | ff1_b  | ff2_b ]
    w1x_ref,     # (Lp, Lp)           ff_1 x-part
    w2x_ref,     # (Lp, Lp)           ff_2 x-part
    cw_ref,      # (n_cos, Lp)        cos_embedding weight
    cb_ref,      # (1, Lp)            cos_embedding bias
    w3x_ref,     # (Lp, Lp)           ff_3 x-part
    w3as_ref,    # (A+S, Lp)          ff_3 [action|state]-part (fused)
    b3_ref,      # (1, Lp)
    w4r_ref,     # (1, Lp)            ff_4 weight as a row
    b4_ref,      # (1, 1)
    out_ref,     # (TB, T)            lane-dense output tile
    *,
    mxu_dtype=jnp.float32,
):
    f32 = jnp.float32

    def mm(a, w_ref):
        # bf16 MXU inputs (optional) with f32 accumulation.
        return jnp.dot(a.astype(mxu_dtype), w_ref[...].astype(mxu_dtype),
                       preferred_element_type=f32)

    TB = xs_ref.shape[0]
    T = taus_ref.shape[0] // TB
    Lp = w1x_ref.shape[0]

    xs = xs_ref[...]                                               # (TB, S+A)

    # One fused lane-dense matmul for every xs-consuming layer partial.
    hx = mm(xs, wxs_ref) + bxs_ref[...]                            # (TB, 3*Lp)

    # x = relu(head(xs))
    h = jnp.maximum(hx[:, :Lp], 0.0)                               # (TB, Lp)
    # x = relu(ff_1(cat(x, xs)))  (split-weight form)
    x = jnp.maximum(mm(h, w1x_ref) + hx[:, Lp:2 * Lp], 0.0)        # (TB, Lp)
    # x = relu(ff_2(cat(x, xs)))
    x = jnp.maximum(mm(x, w2x_ref) + hx[:, 2 * Lp:], 0.0)          # (TB, Lp)

    # cos embedding: cos(tau * pi*i), i = 1..n_cos
    cos = jnp.cos(taus_ref[...] * pis_ref[...])                    # (TB*T, n_cos)
    cos_x = jnp.maximum(mm(cos, cw_ref) + cb_ref[...], 0.0)        # (TB*T, Lp)

    # (x.unsqueeze(1) * cos_x).view(TB*T, Lp)  — leading-dim split/merge only.
    xm = (x[:, None, :] * cos_x.reshape(TB, T, Lp)).reshape(TB * T, Lp)

    # x = relu(ff_3(cat(xm, action_rep, state_rep)))  (split-weight, act+state fused)
    x3 = jnp.maximum(mm(xm, w3x_ref) + mm(as_ref[...], w3as_ref) + b3_ref[...],
                     0.0)                                          # (TB*T, Lp)

    # ff_4 as VPU multiply + lane reduce, stored lane-dense as (TB, T).
    o = jnp.sum(x3.reshape(TB, T, Lp) * w4r_ref[...][None, :, :], axis=-1)
    out_ref[...] = (o + b4_ref[...]).astype(out_ref.dtype)         # (TB, T)


def _torch_linear_init(key, fan_in, fan_out):
    """Deterministic init mimicking torch.nn.Linear default (uniform +/- 1/sqrt(fan_in)).
    Returned weight is already transposed to (fan_in, fan_out)."""
    kw, kb = jax.random.split(key)
    bound = 1.0 / math.sqrt(fan_in)
    w = jax.random.uniform(kw, (fan_in, fan_out), jnp.float32, -bound, bound)
    b = jax.random.uniform(kb, (1, fan_out), jnp.float32, -bound, bound)
    return w, b


def init_deep_iqn_params(key, state_size, action_size, layer_size, n_cos=64):
    input_dim = action_size + state_size + layer_size
    ks = jax.random.split(key, 6)
    head_w, head_b = _torch_linear_init(ks[0], state_size + action_size, layer_size)
    ff1_w, ff1_b = _torch_linear_init(ks[1], input_dim, layer_size)
    ff2_w, ff2_b = _torch_linear_init(ks[2], input_dim, layer_size)
    cos_w, cos_b = _torch_linear_init(ks[3], n_cos, layer_size)
    ff3_w, ff3_b = _torch_linear_init(ks[4], input_dim, layer_size)
    ff4_w, ff4_b = _torch_linear_init(ks[5], layer_size, 1)
    return dict(head_w=head_w, head_b=head_b, ff1_w=ff1_w, ff1_b=ff1_b,
                ff2_w=ff2_w, ff2_b=ff2_b, cos_w=cos_w, cos_b=cos_b,
                ff3_w=ff3_w, ff3_b=ff3_b, ff4_w=ff4_w, ff4_b=ff4_b)


def _torch_repeat_pattern(a, num_tau):
    """Exact translation of:
       a.repeat(num_tau, 1).reshape(num_tau, B*D).transpose(0,1).reshape(B*num_tau, D)
    (this is an element interleave, NOT a per-row broadcast of a[b])."""
    B, D = a.shape
    r = jnp.tile(a, (num_tau, 1)).reshape(num_tau, B * D)
    r = r.T.reshape(B * num_tau, D)
    return r


def _pad2(w, rows, cols):
    return jnp.pad(w, ((0, rows - w.shape[0]), (0, cols - w.shape[1])))


def deep_iqn_forward(params, state, action, taus, *, layer_size, n_cos=64,
                     use_bf16_matmul=False):
    """Returns (quantiles (B, T, 1), taus (B, T, 1))."""
    B, S = state.shape
    A = action.shape[1]
    T = taus.shape[1]
    L = layer_size
    Lp = ((L + 127) // 128) * 128          # pad layer_size to full vreg lanes
    Din = S + A

    # --- input prep (pure data movement, matches the torch module exactly) ---
    xs = jnp.concatenate([state, action], axis=1)                   # (B, S+A)
    taus2 = taus.reshape(B * T, 1)                                  # row r = taus[r//T, r%T]
    as2 = jnp.concatenate([_torch_repeat_pattern(action, T),
                           _torch_repeat_pattern(state, T)], axis=1)  # (B*T, A+S)
    pis = (math.pi * jnp.arange(1, n_cos + 1, dtype=jnp.float32)).reshape(1, n_cos)

    # --- weight prep: zero-pad L -> Lp, fuse xs-consuming weights ---
    head_w = _pad2(params['head_w'], Din, Lp)
    w1s = _pad2(params['ff1_w'][L:], Din, Lp)
    w2s = _pad2(params['ff2_w'][L:], Din, Lp)
    wxs = jnp.concatenate([head_w, w1s, w2s], axis=1)               # (Din, 3*Lp)
    bxs = jnp.concatenate([_pad2(params['head_b'], 1, Lp),
                           _pad2(params['ff1_b'], 1, Lp),
                           _pad2(params['ff2_b'], 1, Lp)], axis=1)  # (1, 3*Lp)

    w1x = _pad2(params['ff1_w'][:L], Lp, Lp)
    w2x = _pad2(params['ff2_w'][:L], Lp, Lp)
    cos_w = _pad2(params['cos_w'], n_cos, Lp)
    cos_b = _pad2(params['cos_b'], 1, Lp)
    w3x = _pad2(params['ff3_w'][:L], Lp, Lp)
    w3as = _pad2(params['ff3_w'][L:], Din, Lp)                      # [action|state] rows
    b3 = _pad2(params['ff3_b'], 1, Lp)
    w4r = _pad2(params['ff4_w'], Lp, 1).T                           # (1, Lp)
    b4 = params['ff4_b']                                            # (1, 1)

    # --- grid over the batch dimension (row tiles; weights stay resident) ---
    block_b = min(B, 8) if (B % 8 == 0) else B                      # (8,128) rule safe
    nb = B // block_b

    row_map = lambda i: (i, 0)
    const_map = lambda i: (0, 0)
    in_specs = [
        pl.BlockSpec((block_b, Din), row_map),          # xs
        pl.BlockSpec((block_b * T, 1), row_map),        # taus2
        pl.BlockSpec((block_b * T, Din), row_map),      # as2
        pl.BlockSpec((1, n_cos), const_map),            # pis
        pl.BlockSpec((Din, 3 * Lp), const_map),         # wxs
        pl.BlockSpec((1, 3 * Lp), const_map),           # bxs
        pl.BlockSpec((Lp, Lp), const_map),              # w1x
        pl.BlockSpec((Lp, Lp), const_map),              # w2x
        pl.BlockSpec((n_cos, Lp), const_map),           # cos_w
        pl.BlockSpec((1, Lp), const_map),               # cos_b
        pl.BlockSpec((Lp, Lp), const_map),              # w3x
        pl.BlockSpec((Din, Lp), const_map),             # w3as
        pl.BlockSpec((1, Lp), const_map),               # b3
        pl.BlockSpec((1, Lp), const_map),               # w4r
        pl.BlockSpec((1, 1), const_map),                # b4
    ]

    kfn = functools.partial(
        deep_iqn_kernel,
        mxu_dtype=jnp.bfloat16 if use_bf16_matmul else jnp.float32)

    out2d = pl.pallas_call(
        kfn,
        out_shape=jax.ShapeDtypeStruct((B, T), jnp.float32),
        grid=(nb,),
        in_specs=in_specs,
        out_specs=pl.BlockSpec((block_b, T), row_map),
        compiler_params=pltpu.CompilerParams(
            dimension_semantics=("parallel",)),
    )(xs, taus2, as2, pis, wxs, bxs, w1x, w2x, cos_w, cos_b,
      w3x, w3as, b3, w4r, b4)

    return out2d.reshape(B, T, 1), taus.reshape(B, T, 1)


def deep_iqn_reference(params, state, action, taus, *, layer_size, n_cos=64):
    """Pure-JAX reference mirroring the PyTorch forward literally (for checking)."""
    B, S = state.shape
    A = action.shape[1]
    T = taus.shape[1]
    L = layer_size

    xs = jnp.concatenate([state, action], axis=1)
    x = jax.nn.relu(xs @ params['head_w'] + params['head_b'])
    x = jnp.concatenate([x, xs], axis=1)
    x = jax.nn.relu(x @ params['ff1_w'] + params['ff1_b'])
    x = jnp.concatenate([x, xs], axis=1)
    x = jax.nn.relu(x @ params['ff2_w'] + params['ff2_b'])

    pis = (math.pi * jnp.arange(1, n_cos + 1, dtype=jnp.float32)).reshape(1, 1, n_cos)
    cos = jnp.cos(taus[:, :, None] * pis).reshape(B * T, n_cos)
    cos_x = jax.nn.relu(cos @ params['cos_w'] + params['cos_b']).reshape(B, T, L)
    xm = (x[:, None, :] * cos_x).reshape(B * T, L)

    act2 = _torch_repeat_pattern(action, T)
    st2 = _torch_repeat_pattern(state, T)
    x3 = jnp.concatenate([xm, act2, st2], axis=1)
    x3 = jax.nn.relu(x3 @ params['ff3_w'] + params['ff3_b'])
    out = x3 @ params['ff4_w'] + params['ff4_b']
    return out.reshape(B, T, 1)


if __name__ == "__main__":
    # Small shapes consistent with the module.
    B, S, A, L, T = 2, 8, 4, 32, 16
    N_COS = 64

    key = jax.random.PRNGKey(0)
    k_param, k_state, k_action, k_tau = jax.random.split(key, 4)

    params = init_deep_iqn_params(k_param, S, A, L, N_COS)
    state = jax.random.normal(k_state, (B, S), jnp.float32)
    action = jax.random.normal(k_action, (B, A), jnp.float32)
    # tau sampling (torch.rand in the module) done in glue with jax.random:
    taus = jax.random.uniform(k_tau, (B, T), jnp.float32)

    quantiles, taus_out = deep_iqn_forward(params, state, action, taus,
                                           layer_size=L, n_cos=N_COS)
    quantiles = jax.block_until_ready(quantiles)
    taus_out = jax.block_until_ready(taus_out)

    assert quantiles.shape == (B, T, 1)
    assert taus_out.shape == (B, T, 1)

    ref = deep_iqn_reference(params, state, action, taus, layer_size=L, n_cos=N_COS)
    np.testing.assert_allclose(np.asarray(quantiles), np.asarray(ref),
                               rtol=1e-3, atol=1e-3)

    print("KERNEL_OK")
</pallas_src>

<mosaic_0001>
module attributes {stable_mosaic.version = 11 : i64} {
  func.func @deep_iqn_kernel(%arg0: i32, %arg1: memref<2x12xf32, #tpu.memory_space<vmem>>, %arg2: memref<32x1xf32, #tpu.memory_space<vmem>>, %arg3: memref<32x12xf32, #tpu.memory_space<vmem>>, %arg4: memref<1x64xf32, #tpu.memory_space<vmem>>, %arg5: memref<12x384xf32, #tpu.memory_space<vmem>>, %arg6: memref<1x384xf32, #tpu.memory_space<vmem>>, %arg7: memref<128x128xf32, #tpu.memory_space<vmem>>, %arg8: memref<128x128xf32, #tpu.memory_space<vmem>>, %arg9: memref<64x128xf32, #tpu.memory_space<vmem>>, %arg10: memref<1x128xf32, #tpu.memory_space<vmem>>, %arg11: memref<128x128xf32, #tpu.memory_space<vmem>>, %arg12: memref<12x128xf32, #tpu.memory_space<vmem>>, %arg13: memref<1x128xf32, #tpu.memory_space<vmem>>, %arg14: memref<1x128xf32, #tpu.memory_space<vmem>>, %arg15: memref<1x1xf32, #tpu.memory_space<vmem>>, %arg16: memref<2x16xf32, #tpu.memory_space<vmem>>) attributes {dimension_semantics = [#tpu.dimension_semantics<parallel>], iteration_bounds = array<i64: 1>, scalar_prefetch = 0 : i64, scratch_operands = 0 : i64, tpu.core_type = #tpu.core_type<tc>, window_params = [{transform_indices = @transform_0, window_bounds = array<i64: 2, 12>}, {transform_indices = @transform_1, window_bounds = array<i64: 32, 1>}, {transform_indices = @transform_2, window_bounds = array<i64: 32, 12>}, {pipeline_mode = #tpu.pipeline_mode<synchronous>, transform_indices = @transform_3, window_bounds = array<i64: 1, 64>}, {pipeline_mode = #tpu.pipeline_mode<synchronous>, transform_indices = @transform_4, window_bounds = array<i64: 12, 384>}, {pipeline_mode = #tpu.pipeline_mode<synchronous>, transform_indices = @transform_5, window_bounds = array<i64: 1, 384>}, {pipeline_mode = #tpu.pipeline_mode<synchronous>, transform_indices = @transform_6, window_bounds = array<i64: 128, 128>}, {pipeline_mode = #tpu.pipeline_mode<synchronous>, transform_indices = @transform_7, window_bounds = array<i64: 128, 128>}, {pipeline_mode = #tpu.pipeline_mode<synchronous>, transform_indices = @transform_8, window_bounds = array<i64: 64, 128>}, {pipeline_mode = #tpu.pipeline_mode<synchronous>, transform_indices = @transform_9, window_bounds = array<i64: 1, 128>}, {pipeline_mode = #tpu.pipeline_mode<synchronous>, transform_indices = @transform_10, window_bounds = array<i64: 128, 128>}, {pipeline_mode = #tpu.pipeline_mode<synchronous>, transform_indices = @transform_11, window_bounds = array<i64: 12, 128>}, {pipeline_mode = #tpu.pipeline_mode<synchronous>, transform_indices = @transform_12, window_bounds = array<i64: 1, 128>}, {pipeline_mode = #tpu.pipeline_mode<synchronous>, transform_indices = @transform_13, window_bounds = array<i64: 1, 128>}, {pipeline_mode = #tpu.pipeline_mode<synchronous>, transform_indices = @transform_14, window_bounds = array<i64: 1, 1>}, {transform_indices = @transform_15, window_bounds = array<i64: 2, 16>}]} {
    %c0 = arith.constant 0 : index
    %c0_0 = arith.constant 0 : index
    %0 = vector.load %arg1[%c0, %c0_0] : memref<2x12xf32, #tpu.memory_space<vmem>>, vector<2x12xf32>
    %c0_1 = arith.constant 0 : index
    %c0_2 = arith.constant 0 : index
    %1 = vector.load %arg5[%c0_1, %c0_2] : memref<12x384xf32, #tpu.memory_space<vmem>>, vector<12x384xf32>
    %cst = arith.constant dense<0.000000e+00> : vector<2x384xf32>
    %2 = tpu.matmul %0, %1, %cst {dimension_numbers = #tpu.dot_dimension_numbers<[1], [0], [0], [1], [0, 0, 1, 1], [], []>} : vector<2x12xf32>, vector<12x384xf32>, vector<2x384xf32> -> vector<2x384xf32>
    %c0_3 = arith.constant 0 : index
    %c0_4 = arith.constant 0 : index
    %3 = vector.load %arg6[%c0_3, %c0_4] : memref<1x384xf32, #tpu.memory_space<vmem>>, vector<1x384xf32>
    %4 = vector.broadcast %3 : vector<1x384xf32> to vector<2x384xf32>
    %5 = arith.addf %2, %4 : vector<2x384xf32>
    %6 = vector.extract_strided_slice %5 {offsets = [0, 0], sizes = [2, 128], strides = [1, 1]} : vector<2x384xf32> to vector<2x128xf32>
    %cst_5 = arith.constant 0.000000e+00 : f32
    %7 = vector.broadcast %cst_5 : f32 to vector<2x128xf32>
    %8 = arith.maximumf %6, %7 : vector<2x128xf32>
    %c0_6 = arith.constant 0 : index
    %c0_7 = arith.constant 0 : index
    %9 = vector.load %arg7[%c0_6, %c0_7] : memref<128x128xf32, #tpu.memory_space<vmem>>, vector<128x128xf32>
    %cst_8 = arith.constant dense<0.000000e+00> : vector<2x128xf32>
    %10 = tpu.matmul %8, %9, %cst_8 {dimension_numbers = #tpu.dot_dimension_numbers<[1], [0], [0], [1], [0, 0, 1, 1], [], []>} : vector<2x128xf32>, vector<128x128xf32>, vector<2x128xf32> -> vector<2x128xf32>
    %11 = vector.extract_strided_slice %5 {offsets = [0, 128], sizes = [2, 128], strides = [1, 1]} : vector<2x384xf32> to vector<2x128xf32>
    %12 = arith.addf %10, %11 : vector<2x128xf32>
    %cst_9 = arith.constant 0.000000e+00 : f32
    %13 = vector.broadcast %cst_9 : f32 to vector<2x128xf32>
    %14 = arith.maximumf %12, %13 : vector<2x128xf32>
    %c0_10 = arith.constant 0 : index
    %c0_11 = arith.constant 0 : index
    %15 = vector.load %arg8[%c0_10, %c0_11] : memref<128x128xf32, #tpu.memory_space<vmem>>, vector<128x128xf32>
    %cst_12 = arith.constant dense<0.000000e+00> : vector<2x128xf32>
    %16 = tpu.matmul %14, %15, %cst_12 {dimension_numbers = #tpu.dot_dimension_numbers<[1], [0], [0], [1], [0, 0, 1, 1], [], []>} : vector<2x128xf32>, vector<128x128xf32>, vector<2x128xf32> -> vector<2x128xf32>
    %17 = vector.extract_strided_slice %5 {offsets = [0, 256], sizes = [2, 128], strides = [1, 1]} : vector<2x384xf32> to vector<2x128xf32>
    %18 = arith.addf %16, %17 : vector<2x128xf32>
    %cst_13 = arith.constant 0.000000e+00 : f32
    %19 = vector.broadcast %cst_13 : f32 to vector<2x128xf32>
    %20 = arith.maximumf %18, %19 : vector<2x128xf32>
    %c0_14 = arith.constant 0 : index
    %c0_15 = arith.constant 0 : index
    %21 = vector.load %arg2[%c0_14, %c0_15] : memref<32x1xf32, #tpu.memory_space<vmem>>, vector<32x1xf32>
    %c0_16 = arith.constant 0 : index
    %c0_17 = arith.constant 0 : index
    %22 = vector.load %arg4[%c0_16, %c0_17] : memref<1x64xf32, #tpu.memory_space<vmem>>, vector<1x64xf32>
    %23 = vector.broadcast %21 : vector<32x1xf32> to vector<32x64xf32>
    %24 = vector.broadcast %22 : vector<1x64xf32> to vector<32x64xf32>
    %25 = arith.mulf %23, %24 : vector<32x64xf32>
    %26 = math.cos %25 : vector<32x64xf32>
    %c0_18 = arith.constant 0 : index
    %c0_19 = arith.constant 0 : index
    %27 = vector.load %arg9[%c0_18, %c0_19] : memref<64x128xf32, #tpu.memory_space<vmem>>, vector<64x128xf32>
    %cst_20 = arith.constant dense<0.000000e+00> : vector<32x128xf32>
    %28 = tpu.matmul %26, %27, %cst_20 {dimension_numbers = #tpu.dot_dimension_numbers<[1], [0], [0], [1], [0, 0, 1, 1], [], []>} : vector<32x64xf32>, vector<64x128xf32>, vector<32x128xf32> -> vector<32x128xf32>
    %c0_21 = arith.constant 0 : index
    %c0_22 = arith.constant 0 : index
    %29 = vector.load %arg10[%c0_21, %c0_22] : memref<1x128xf32, #tpu.memory_space<vmem>>, vector<1x128xf32>
    %30 = vector.broadcast %29 : vector<1x128xf32> to vector<32x128xf32>
    %31 = arith.addf %28, %30 : vector<32x128xf32>
    %cst_23 = arith.constant 0.000000e+00 : f32
    %32 = vector.broadcast %cst_23 : f32 to vector<32x128xf32>
    %33 = arith.maximumf %31, %32 : vector<32x128xf32>
    %34 = vector.shape_cast %20 : vector<2x128xf32> to vector<2x1x128xf32>
    %35 = vector.shape_cast %33 : vector<32x128xf32> to vector<2x16x128xf32>
    %36 = vector.broadcast %34 : vector<2x1x128xf32> to vector<2x16x128xf32>
    %37 = arith.mulf %36, %35 : vector<2x16x128xf32>
    %38 = vector.shape_cast %37 : vector<2x16x128xf32> to vector<32x128xf32>
    %c0_24 = arith.constant 0 : index
    %c0_25 = arith.constant 0 : index
    %39 = vector.load %arg11[%c0_24, %c0_25] : memref<128x128xf32, #tpu.memory_space<vmem>>, vector<128x128xf32>
    %cst_26 = arith.constant dense<0.000000e+00> : vector<32x128xf32>
    %40 = tpu.matmul %38, %39, %cst_26 {dimension_numbers = #tpu.dot_dimension_numbers<[1], [0], [0], [1], [0, 0, 1, 1], [], []>} : vector<32x128xf32>, vector<128x128xf32>, vector<32x128xf32> -> vector<32x128xf32>
    %c0_27 = arith.constant 0 : index
    %c0_28 = arith.constant 0 : index
    %41 = vector.load %arg3[%c0_27, %c0_28] : memref<32x12xf32, #tpu.memory_space<vmem>>, vector<32x12xf32>
    %c0_29 = arith.constant 0 : index
    %c0_30 = arith.constant 0 : index
    %42 = vector.load %arg12[%c0_29, %c0_30] : memref<12x128xf32, #tpu.memory_space<vmem>>, vector<12x128xf32>
    %cst_31 = arith.constant dense<0.000000e+00> : vector<32x128xf32>
    %43 = tpu.matmul %41, %42, %cst_31 {dimension_numbers = #tpu.dot_dimension_numbers<[1], [0], [0], [1], [0, 0, 1, 1], [], []>} : vector<32x12xf32>, vector<12x128xf32>, vector<32x128xf32> -> vector<32x128xf32>
    %44 = arith.addf %40, %43 : vector<32x128xf32>
    %c0_32 = arith.constant 0 : index
    %c0_33 = arith.constant 0 : index
    %45 = vector.load %arg13[%c0_32, %c0_33] : memref<1x128xf32, #tpu.memory_space<vmem>>, vector<1x128xf32>
    %46 = vector.broadcast %45 : vector<1x128xf32> to vector<32x128xf32>
    %47 = arith.addf %44, %46 : vector<32x128xf32>
    %cst_34 = arith.constant 0.000000e+00 : f32
    %48 = vector.broadcast %cst_34 : f32 to vector<32x128xf32>
    %49 = arith.maximumf %47, %48 : vector<32x128xf32>
    %50 = vector.shape_cast %49 : vector<32x128xf32> to vector<2x16x128xf32>
    %c0_35 = arith.constant 0 : index
    %c0_36 = arith.constant 0 : index
    %51 = vector.load %arg14[%c0_35, %c0_36] : memref<1x128xf32, #tpu.memory_space<vmem>>, vector<1x128xf32>
    %52 = vector.shape_cast %51 : vector<1x128xf32> to vector<1x1x128xf32>
    %53 = vector.broadcast %52 : vector<1x1x128xf32> to vector<2x16x128xf32>
    %54 = arith.mulf %50, %53 : vector<2x16x128xf32>
    %cst_37 = arith.constant dense<0.000000e+00> : vector<2x16xf32>
    %55 = vector.multi_reduction <add>, %54, %cst_37 [2] : vector<2x16x128xf32> to vector<2x16xf32>
    %c0_38 = arith.constant 0 : index
    %c0_39 = arith.constant 0 : index
    %56 = vector.load %arg15[%c0_38, %c0_39] : memref<1x1xf32, #tpu.memory_space<vmem>>, vector<1x1xf32>
    %57 = vector.broadcast %56 : vector<1x1xf32> to vector<2x16xf32>
    %58 = arith.addf %55, %57 : vector<2x16xf32>
    %c0_40 = arith.constant 0 : index
    %c0_41 = arith.constant 0 : index
    %59 = vector.load %arg16[%c0_40, %c0_41] : memref<2x16xf32, #tpu.memory_space<vmem>>, vector<2x16xf32>
    tpu.vector_store %arg16[%c0_40, %c0_41], %58 {strides = array<i32>} : memref<2x16xf32, #tpu.memory_space<vmem>>, vector<2x16xf32>,
    return
  }
  func.func @transform_0(%arg0: i32) -> (i32, i32) {
    %c0_i32 = arith.constant 0 : i32
    %c0_i32_0 = arith.constant 0 : i32
    return %arg0, %c0_i32 : i32, i32
  }
  func.func @transform_1(%arg0: i32) -> (i32, i32) {
    %c0_i32 = arith.constant 0 : i32
    %c0_i32_0 = arith.constant 0 : i32
    return %arg0, %c0_i32 : i32, i32
  }
  func.func @transform_2(%arg0: i32) -> (i32, i32) {
    %c0_i32 = arith.constant 0 : i32
    %c0_i32_0 = arith.constant 0 : i32
    return %arg0, %c0_i32 : i32, i32
  }
  func.func @transform_3(%arg0: i32) -> (i32, i32) {
    %c0_i32 = arith.constant 0 : i32
    %c0_i32_0 = arith.constant 0 : i32
    %c0_i32_1 = arith.constant 0 : i32
    return %c0_i32, %c0_i32_0 : i32, i32
  }
  func.func @transform_4(%arg0: i32) -> (i32, i32) {
    %c0_i32 = arith.constant 0 : i32
    %c0_i32_0 = arith.constant 0 : i32
    %c0_i32_1 = arith.constant 0 : i32
    return %c0_i32, %c0_i32_0 : i32, i32
  }
  func.func @transform_5(%arg0: i32) -> (i32, i32) {
    %c0_i32 = arith.constant 0 : i32
    %c0_i32_0 = arith.constant 0 : i32
    %c0_i32_1 = arith.constant 0 : i32
    return %c0_i32, %c0_i32_0 : i32, i32
  }
  func.func @transform_6(%arg0: i32) -> (i32, i32) {
    %c0_i32 = arith.constant 0 : i32
    %c0_i32_0 = arith.constant 0 : i32
    %c0_i32_1 = arith.constant 0 : i32
    return %c0_i32, %c0_i32_0 : i32, i32
  }
  func.func @transform_7(%arg0: i32) -> (i32, i32) {
    %c0_i32 = arith.constant 0 : i32
    %c0_i32_0 = arith.constant 0 : i32
    %c0_i32_1 = arith.constant 0 : i32
    return %c0_i32, %c0_i32_0 : i32, i32
  }
  func.func @transform_8(%arg0: i32) -> (i32, i32) {
    %c0_i32 = arith.constant 0 : i32
    %c0_i32_0 = arith.constant 0 : i32
    %c0_i32_1 = arith.constant 0 : i32
    return %c0_i32, %c0_i32_0 : i32, i32
  }
  func.func @transform_9(%arg0: i32) -> (i32, i32) {
    %c0_i32 = arith.constant 0 : i32
    %c0_i32_0 = arith.constant 0 : i32
    %c0_i32_1 = arith.constant 0 : i32
    return %c0_i32, %c0_i32_0 : i32, i32
  }
  func.func @transform_10(%arg0: i32) -> (i32, i32) {
    %c0_i32 = arith.constant 0 : i32
    %c0_i32_0 = arith.constant 0 : i32
    %c0_i32_1 = arith.constant 0 : i32
    return %c0_i32, %c0_i32_0 : i32, i32
  }
  func.func @transform_11(%arg0: i32) -> (i32, i32) {
    %c0_i32 = arith.constant 0 : i32
    %c0_i32_0 = arith.constant 0 : i32
    %c0_i32_1 = arith.constant 0 : i32
    return %c0_i32, %c0_i32_0 : i32, i32
  }
  func.func @transform_12(%arg0: i32) -> (i32, i32) {
    %c0_i32 = arith.constant 0 : i32
    %c0_i32_0 = arith.constant 0 : i32
    %c0_i32_1 = arith.constant 0 : i32
    return %c0_i32, %c0_i32_0 : i32, i32
  }
  func.func @transform_13(%arg0: i32) -> (i32, i32) {
    %c0_i32 = arith.constant 0 : i32
    %c0_i32_0 = arith.constant 0 : i32
    %c0_i32_1 = arith.constant 0 : i32
    return %c0_i32, %c0_i32_0 : i32, i32
  }
  func.func @transform_14(%arg0: i32) -> (i32, i32) {
    %c0_i32 = arith.constant 0 : i32
    %c0_i32_0 = arith.constant 0 : i32
    %c0_i32_1 = arith.constant 0 : i32
    return %c0_i32, %c0_i32_0 : i32, i32
  }
  func.func @transform_15(%arg0: i32) -> (i32, i32) {
    %c0_i32 = arith.constant 0 : i32
    %c0_i32_0 = arith.constant 0 : i32
    return %arg0, %c0_i32 : i32, i32
  }
}

</mosaic_0001>

<bundles_post_ra>
// kernel: tpu_custom_call.1
= control target key start
LH: loop header
LB: loop body
LE: loop exit
PB: predicated region body
PF: predicated region fallthrough
CT: control target
= control target key end

     0   :  { %s2142_s0 = inlined_call_operand.hbm [shape: f32[2,12], index: 0, kind: input, shape index: {}]   ;;  %s2143_s1 = inlined_call_operand.vmem [shape: f32[32,1], index: 1, kind: input, shape index: {}]   ;;  %s2144_s2 = inlined_call_operand.vmem [shape: f32[32,12], index: 2, kind: input, shape index: {}]   ;;  %s2145_s3 = inlined_call_operand.vmem [shape: f32[1,64], index: 3, kind: input, shape index: {}]   ;;  %s2146_s4 = inlined_call_operand.hbm [shape: f32[12,384], index: 4, kind: input, shape index: {}]   ;;  %s2147_s5 = inlined_call_operand.vmem [shape: f32[1,384], index: 5, kind: input, shape index: {}]   ;;  %s2148_s6 = inlined_call_operand.hbm [shape: f32[128,128], index: 6, kind: input, shape index: {}]   ;;  %s2149_s7 = inlined_call_operand.hbm [shape: f32[128,128], index: 7, kind: input, shape index: {}]   ;;  %s2150_s8 = inlined_call_operand.vmem [shape: f32[64,128], index: 8, kind: input, shape index: {}]   ;;  %s2151_s9 = inlined_call_operand.vmem [shape: f32[1,128], index: 9, kind: input, shape index: {}]   ;;  %s2152_s10 = inlined_call_operand.hbm [shape: f32[128,128], index: 10, kind: input, shape index: {}]   ;;  %s2153_s11 = inlined_call_operand.hbm [shape: f32[12,128], index: 11, kind: input, shape index: {}]   ;;  %s2154_s12 = inlined_call_operand.vmem [shape: f32[1,128], index: 12, kind: input, shape index: {}]   ;;  %s2155_s13 = inlined_call_operand.vmem [shape: f32[1,128], index: 13, kind: input, shape index: {}]   ;;  %s2156_s14 = inlined_call_operand.<no memory space> [shape: f32[1,1], index: 14, kind: input, shape index: {}]   ;;  %s2157_s15 = inlined_call_operand.hbm [shape: f32[2,16], index: 15, kind: output, shape index: {}]  }
   0x1   :  { %v20_v0 = vstv %s2156_s14 }
   0x2   :  { %21 = vst [vmem:[#allocation2] sm:$0x1] %v20_v0 }
   0x3   :  { %22 = vsyncpa [#allocation4], 0 }
   0x4   :  { %23 = vsyncpa [#allocation7], 0 }
   0x5   :  { %24 = vsyncpa [#allocation10], 0 }
   0x6   :  { %25 = vsyncpa [#allocation13], 0  ;;  %s48_s22 = sshll.u32 %s2146_s4, 4  ;;  %s49_s22 = int_to_ptr.hbm [resolvable:$true] %s48_s22 }
   0x7   :  { %26 = vsyncpa [#allocation5], 0  ;;  %s1430_s23 = smov [#allocation6]   ;;  %s1431_s25 = smov 384  }
   0x8   :  { %s50_s24 = sshll.u32 %s1430_s23, 4  ;;  %s1432_s26 = smov 24   ;;  %s51_s24 = int_to_ptr.vmem [resolvable:$true] %s50_s24 }
   0x9   :  { %56 = dma.hbm_to_vmem [thread:$0]  %s49_s22, 768, %s51_s24, [#allocation7], %s1431_s25, %s1431_s25, %s1432_s26  }
   0xa   :  { %s76_s14 = sshll.u32 %s2149_s7, 4  ;;  %s1433_s29 = smov [#allocation9]   ;;  %s77_s14 = int_to_ptr.hbm [resolvable:$true] %s76_s14 }
   0xb   :  { %s78_s30 = sshll.u32 %s1433_s29, 4  ;;  %s32_s18 = sshll.u32 %s2142_s0, 4  ;;  %s79_s30 = int_to_ptr.vmem [resolvable:$true] %s78_s30  ;;  %s33_s18 = int_to_ptr.hbm [resolvable:$true] %s32_s18 }
   0xc   :  { %s1434_s4 = smov 128   ;;  %s1435_s19 = smov 8  }
   0xd   :  { %84 = dma.hbm_to_vmem [thread:$0]  %s77_s14, 2048, %s79_s30, [#allocation10], %s1434_s4, %s1434_s4, %s1435_s19  }
   0xe   :  { %s63_s22 = sshll.u32 %s2148_s6, 4  ;;  %s1436_s23 = smov [#allocation3]   ;;  %s64_s22 = int_to_ptr.hbm [resolvable:$true] %s63_s22 }
   0xf   :  { %s34_s24 = sshll.u32 %s1436_s23, 4  ;;  %s1437_s7 = smov [#allocation8]   ;;  %s35_s24 = int_to_ptr.vmem [resolvable:$true] %s34_s24 }
  0x10   :  { %37 = dma.hbm_to_vmem [thread:$0]  %s33_s18, 32, %s35_s24, [#allocation4]  }
  0x11   :  { %s65_s25 = sshll.u32 %s1437_s7, 4  ;;  %s93_s0 = sshll.u32 %s2152_s10, 4  ;;  %s66_s25 = int_to_ptr.vmem [resolvable:$true] %s65_s25  ;;  %s94_s0 = int_to_ptr.hbm [resolvable:$true] %s93_s0 }
  0x12   :  { %71 = dma.hbm_to_vmem [thread:$0]  %s64_s22, 2048, %s66_s25, [#allocation7], %s1434_s4, %s1434_s4, %s1435_s19  }
  0x13   :  { %s106_s29 = sshll.u32 %s2153_s11, 4  ;;  %s1438_s30 = smov [#allocation11]   ;;  %s107_s29 = int_to_ptr.hbm [resolvable:$true] %s106_s29 }
  0x14   :  { %s95_s6 = sshll.u32 %s1438_s30, 4  ;;  %s1439_s16 = smov [#allocation12]   ;;  %s96_s6 = int_to_ptr.vmem [resolvable:$true] %s95_s6 }
  0x15   :  { %101 = dma.hbm_to_vmem [thread:$0]  %s94_s0, 2048, %s96_s6, [#allocation10], %s1434_s4, %s1434_s4, %s1435_s19  }
  0x16   :  { %s108_s17 = sshll.u32 %s1439_s16, 4  ;;  %s109_s17 = int_to_ptr.vmem [resolvable:$true] %s108_s17 }
  0x17   :  { %114 = dma.hbm_to_vmem [thread:$0]  %s107_s29, 256, %s109_s17, [#allocation13], %s1434_s4, %s1434_s4, %s1435_s19  }
  0x18   :  { %1420 = dma.done.wait [#allocation4], 32  }
  0x19   :  { %1421 = vsyncadd [#allocation4], 4294967264 }
  0x1a   :  { %1422 = dma.done.wait [#allocation7], 2816  }
  0x1b   :  { %1423 = vsyncadd [#allocation7], 4294964480 }
  0x1c   :  { %1424 = dma.done.wait [#allocation10], 4096  }
  0x1d   :  { %1425 = vsyncadd [#allocation10], 4294963200 }
  0x1e   :  { %1426 = dma.done.wait [#allocation13], 256  }
  0x1f   :  { %1427 = vsyncadd [#allocation13], 4294967040  ;;  %v1440_v1 = vmov 0   ;;  %vm164_vm0 = vcmask 1043456   ;;  %v311_v2 = vld [vmem:[%s2143_s1 + $0x10] sm:$0xff]  ;;  %v309_v3 = vld [vmem:[%s2143_s1] sm:$0xff] }
  0x20   :  { %1244 = vset.pattern.permute.xlu1 %v1440_v1  ;;  %1243 = vset.pattern.permute.xlu0 %v1440_v1  ;;  %v149_v4 = vld [vmem:[#allocation6 + $0x18] sm:$0xf]  ;;  %v146_v5 = vld [vmem:[#allocation6] sm:$0xff]  ;;  %v145_v6 = vld [vmem:[#allocation3] sm:$0x3]  ;;  %vm160_vm1 = vcmask 97280  }
  0x21   :  { %1245 = vset.pattern.permute.xlu2 %v1440_v1  ;;  %326 = vperm.xlu1 %1244, %v311_v2   ;;  %v151_v7 = vld [vmem:[#allocation6 + $0x28] sm:$0xf]  ;;  %v148_v8 = vld [vmem:[#allocation6 + $0x10] sm:$0xff]  ;;  %v249_v12 = vld [vmem:[#allocation8 + $0x70] sm:$0xff]  ;;  %v1441_v59 = vmov 683565275  }
  0x22   :  { %316 = vperm.xlu0 %1243, %v309_v3   ;;  %1198 = vmatpush.msk.msra.mxu0 %vm164_vm0, %v149_v4  ;;  %v250_v9 = vld [vmem:[#allocation8 + $0x78] sm:$0xff]  ;;  %v312_v10 = vld [vmem:[%s2143_s1 + $0x18] sm:$0xff]  ;;  %v245_v16 = vld [vmem:[#allocation8 + $0x50] sm:$0xff]  ;;  %v1442_v61 = vmov 2475754826   ;;  %s1185_s14 = sshll.u32 %s2157_s15, 4  ;;  %s1186_s14 = int_to_ptr.hbm [resolvable:$true] %s1185_s14 }
  0x23   :  { %1202 = vmatpush.msk.msra.mxu3 %vm164_vm0, %v151_v7  ;;  %v310_v11 = vld [vmem:[%s2143_s1 + $0x8] sm:$0xff]  ;;  %v248_v13 = vld [vmem:[#allocation8 + $0x68] sm:$0xff]  ;;  %v247_v14 = vld [vmem:[#allocation8 + $0x60] sm:$0xff]  ;;  %v1443_v63 = vmov 2131351028  }
  0x24   :  { %189 = vmatpush.msra.mxu0 %v146_v5  ;;  %v246_v15 = vld [vmem:[#allocation8 + $0x58] sm:$0xff]  ;;  %v244_v17 = vld [vmem:[#allocation8 + $0x48] sm:$0xff]  ;;  %v243_v18 = vld [vmem:[#allocation8 + $0x40] sm:$0xff]  ;;  %v1444_v2 = vmov 2102212464  }
  0x25   :  { %1199 = vmatmul.msk.f32.vlgmr.msra.gmra.mxu0 %vm160_vm1, %v145_v6  ;;  %229 = vmatpush.msra.mxu3 %v148_v8  ;;  %v242_v19 = vld [vmem:[#allocation8 + $0x38] sm:$0xff]  ;;  %v241_v20 = vld [vmem:[#allocation8 + $0x30] sm:$0xff]  ;;  %v240_v21 = vld [vmem:[#allocation8 + $0x28] sm:$0xff]  ;;  %v1445_v4 = vmov 920167782  }
  0x26   :  { %1203 = vmatmul.msk.f32.vlgmr.msra.gmra.mxu3 %vm160_vm1, %v145_v6  ;;  %v239_v22 = vld [vmem:[#allocation8 + $0x20] sm:$0xff]  ;;  %v238_v23 = vld [vmem:[#allocation8 + $0x18] sm:$0xff]  ;;  %v1246_v24 = vld [vmem:[%s2145_s3] ss:$0 sm:$0xff] }
  0x27   :  { %251 = vmatpush.msrb.mxu3 %v250_v9  ;;  %v237_v25 = vld [vmem:[#allocation8 + $0x10] sm:$0xff]  ;;  %v236_v26 = vld [vmem:[#allocation8 + $0x8] sm:$0xff]  ;;  %v235_v31 = vld [vmem:[#allocation8] sm:$0xff] }
  0x28   :  { %v150_v34 = vld [vmem:[#allocation6 + $0x20] sm:$0xf]  ;;  %v147_v36 = vld [vmem:[#allocation6 + $0x8] sm:$0xff]  ;;  %v964_v42 = vld [vmem:[%s2150_s8 + $0x38] sm:$0xff] }
  0x29   :  { %252 = vmatpush.msrb.mxu3 %v249_v12  ;;  %331 = vperm.xlu1 %1244, %v312_v10   ;;  %v963_v43 = vld [vmem:[%s2150_s8 + $0x30] sm:$0xff]  ;;  %v962_v48 = vld [vmem:[%s2150_s8 + $0x28] sm:$0xff]  ;;  %v961_v52 = vld [vmem:[%s2150_s8 + $0x20] sm:$0xff]  ;;  %v1446_v12 = vmov 1326507024  }
  0x2a   :  { %321 = vperm.xlu0 %1243, %v310_v11   ;;  %1200 = vmatpush.msk.msra.mxu1 %vm164_vm0, %v150_v34  ;;  %v960_v57 = vld [vmem:[%s2150_s8 + $0x18] sm:$0xff]  ;;  %v959_v7 = vld [vmem:[%s2150_s8 + $0x10] sm:$0xff] }
  0x2b   :  { %253 = vmatpush.msrb.mxu3 %v248_v13 }
  0x2c   :  { %209 = vmatpush.msra.mxu1 %v147_v36 }
  0x2d   :  { %254 = vmatpush.msrb.mxu3 %v247_v14  ;;  %1201 = vmatmul.msk.f32.vlgmr.msra.gmra.mxu1 %vm160_vm1, %v145_v6 }
  0x2e   :  { %990 = vmatpush.msrb.mxu1 %v964_v42 }
  0x2f   :  { %255 = vmatpush.msrb.mxu3 %v246_v15 }
  0x30   :  { %991 = vmatpush.msrb.mxu1 %v963_v43 }
  0x31   :  { %256 = vmatpush.msrb.mxu3 %v245_v16  ;;  %v958_v16 = vld [vmem:[%s2150_s8 + $0x8] sm:$0xff] }
  0x32   :  { %992 = vmatpush.msrb.mxu1 %v962_v48 }
  0x33   :  { %257 = vmatpush.msrb.mxu3 %v244_v17 }
  0x34   :  { %993 = vmatpush.msrb.mxu1 %v961_v52 }
  0x35   :  { %258 = vmatpush.msrb.mxu3 %v243_v18 }
  0x36   :  { %994 = vmatpush.msrb.mxu1 %v960_v57 }
  0x37   :  { %259 = vmatpush.msrb.mxu3 %v242_v19 }
  0x38   :  { %995 = vmatpush.msrb.mxu1 %v959_v7 }
  0x39   :  { %260 = vmatpush.msrb.mxu3 %v241_v20 }
  0x3a   :  { %996 = vmatpush.msrb.mxu1 %v958_v16 }
  0x3b   :  { %261 = vmatpush.msrb.mxu3 %v240_v21 }
  0x3d   :  { %262 = vmatpush.msrb.mxu3 %v239_v22 }
  0x3f   :  { %263 = vmatpush.msrb.mxu3 %v238_v23 }
  0x41   :  { %264 = vmatpush.msrb.mxu3 %v237_v25 }
  0x43   :  { %265 = vmatpush.msrb.mxu3 %v236_v26 }
  0x45   :  { %266 = vmatpush.msrb.mxu3 %v235_v31  ;;  %v152_v31 = vld [vmem:[%s2147_s5] sm:$0x7] }
  0x46   :  { %v154_v43 = vperm.slane %v152_v31, 0 }
  0x93   :  { %v327_v27 = vpop.permute.xlu1 %326 }
  0x94   :  { %v317_v28 = vpop.permute.xlu0 %316  ;;  %v1571_v29 = vmul.f32 %v1246_v24, %v327_v27 }
  0x95   :  { %v1573_v30 = vmul.f32 %v1246_v24, %v317_v28 }
  0x96   :  { %v652_v32 = vand.u32 2139095040, %v1571_v29 }
  0x97   :  { %v344_v33 = vand.u32 2139095040, %v1573_v30  ;;  %v341_v38 = vand.u32 2147483647, %v1573_v30 }
  0x98   :  { %v653_v37 = vshrl.u32 %v652_v32, 23 }
  0x99   :  { %v345_v35 = vshrl.u32 %v344_v33, 23  ;;  %v348_v46 = vand.u32 8388607, %v341_v38 }
  0x9a   :  { %v1210_v44 = vadd.s32 4294967169, %v653_v37 }
  0x9b   :  { %v1204_v39 = vadd.s32 4294967169, %v345_v35  ;;  %v332_v40 = vpop.permute.xlu1 %331  ;;  %v349_v54 = vor.u32 8388608, %v348_v46 }
  0x9c   :  { %v322_v45 = vpop.permute.xlu0 %321  ;;  %v1588_v47 = vmul.f32 %v1246_v24, %v332_v40  ;;  %v659_v53 = vadd.s32 1, %v1210_v44 }
  0x9d   :  { %v351_v41 = vadd.s32 1, %v1204_v39  ;;  %v1593_v51 = vmul.f32 %v1246_v24, %v322_v45  ;;  %v1625_v14 = vshll.u32 %v349_v54, 8  ;;  %v957_v24 = vld [vmem:[%s2150_s8] sm:$0xff] }
  0x9e   :  { %v806_v56 = vand.u32 2139095040, %v1588_v47  ;;  %vm660_vm3 = vcmp.gt.s32.totalorder %v659_v53, 0  ;;  %997 = vmatpush.msrb.mxu1 %v957_v24 }
  0x9f   :  { %vm352_vm2 = vcmp.gt.s32.totalorder %v351_v41, 0  ;;  %v498_v6 = vand.u32 2139095040, %v1593_v51  ;;  %v661_v20 = vsel %vm660_vm3, %v659_v53, 0  ;;  %v390_v28 = vand.u32 65535, %v1625_v14 }
  0xa0   :  { %v353_v49 = vsel %vm352_vm2, %v351_v41, 0  ;;  %v807_v15 = vshrl.u32 %v806_v56, 23  ;;  %v1655_v32 = vand.u32 31, %v661_v20  ;;  %v391_v39 = vshrl.u32 %v1625_v14, 16 }
  0xa1   :  { %v355_v50 = vand.u32 31, %v353_v49  ;;  %v1598_v55 = vshrl.u32 %v353_v49, 5  ;;  %v499_v23 = vshrl.u32 %v498_v6, 23  ;;  %v1666_v41 = vshrl.u32 %v661_v20, 5 }
  0xa2   :  { %v1213_v35 = vadd.s32 4294967169, %v807_v15  ;;  %v191_v49 = vpop.f32.mrf.mxu0  ;;  %v675_v52 = vshll.u32 %v1444_v2, %v1655_v32  ;;  %v495_v54 = vand.u32 2147483647, %v1593_v51  ;;  %v1678_v56 = vshll.u32 %v1445_v4, %v1655_v32 }
  0xa3   :  { %v1604_v58 = vsub.s32 32, %v355_v50  ;;  %v358_v60 = vshll.u32 %v1441_v59, %v355_v50  ;;  %v361_v62 = vshll.u32 %v1442_v61, %v355_v50  ;;  %v364_v0 = vshll.u32 %v1443_v63, %v355_v50 }
  0xa4   :  { %v367_v3 = vshll.u32 %v1444_v2, %v355_v50  ;;  %v370_v5 = vshll.u32 %v1445_v4, %v355_v50  ;;  %vm373_vm4 = vcmp.lt.s32.totalorder %v1598_v55, 1  ;;  %vm374_vm5 = vcmp.lt.s32.totalorder %v1598_v55, 2 }
  0xa5   :  { %v359_v8 = vshrl.u32 %v1442_v61, %v1604_v58  ;;  %v362_v9 = vshrl.u32 %v1443_v63, %v1604_v58  ;;  %v365_v10 = vshrl.u32 %v1444_v2, %v1604_v58  ;;  %v368_v11 = vshrl.u32 %v1445_v4, %v1604_v58 }
  0xa6   :  { %v371_v13 = vshrl.u32 %v1446_v12, %v1604_v58  ;;  %vm375_vm6 = vcmp.lt.s32.totalorder %v1598_v55, 3  ;;  %vm376_vm7 = vcmp.lt.s32.totalorder %v1598_v55, 4  ;;  %v1207_v40 = vadd.s32 4294967169, %v499_v23 }
  0xa7   :  { %v1630_v17 = vor.u32 %v359_v8, %v358_v60  ;;  %v1632_v18 = vor.u32 %v362_v9, %v361_v62  ;;  %v366_v19 = vor.u32 %v365_v10, %v364_v0  ;;  %v369_v21 = vor.u32 %v368_v11, %v367_v3 }
  0xa8   :  { %v372_v22 = vor.u32 %v371_v13, %v370_v5  ;;  %v813_v46 = vadd.s32 1, %v1213_v35  ;;  %v505_v48 = vadd.s32 1, %v1207_v40  ;;  %v1671_v50 = vsub.s32 32, %v1655_v32 }
  0xa9   :  { %v381_v25 = vsel %vm373_vm4, %v1630_v17, %v1632_v18  ;;  %v382_v26 = vsel %vm376_vm7, %v369_v21, 920167782  ;;  %v385_v27 = vsel %vm373_vm4, %v1632_v18, %v366_v19  ;;  %v357_v0 = vshrl.u32 %v1441_v59, %v1604_v58 }
  0xaa   :  { %v383_v33 = vsel %vm375_vm6, %v366_v19, %v382_v26  ;;  %v386_v34 = vsel %vm376_vm7, %v372_v22, 1326507024  ;;  %vm814_vm8 = vcmp.gt.s32.totalorder %v813_v46, 0  ;;  %vm506_vm9 = vcmp.gt.s32.totalorder %v505_v48, 0 }
  0xab   :  { %v384_v36 = vsel %vm374_vm5, %v381_v25, %v383_v33  ;;  %v387_v37 = vsel %vm375_vm6, %v369_v21, %v386_v34  ;;  %v192_v3 = vadd.f32 %v191_v49, %v154_v43  ;;  %v1684_v7 = vsel %vm814_vm8, %v813_v46, 0 }
  0xac   :  { %v388_v42 = vsel %vm374_vm5, %v385_v27, %v387_v37  ;;  %v415_v53 = vshrl.u32 %v384_v36, 16  ;;  %v507_v8 = vsel %vm506_vm9, %v505_v48, 0  ;;  %v414_v9 = vand.u32 65535, %v384_v36 }
  0xad   :  { %v392_v44 = vand.u32 65535, %v388_v42  ;;  %v393_v45 = vshrl.u32 %v388_v42, 16  ;;  %v1689_v11 = vand.u32 31, %v1684_v7  ;;  %v509_v13 = vand.u32 31, %v507_v8 }
  0xae   :  { %v1686_v10 = vmul.u32 %v415_v53, %v390_v28  ;;  %v234_v58 = vmax.f32 %v192_v3, 0.0  ;;  %v378_v20 = vsel %vm376_vm7, %v366_v19, 2102212464  ;;  %v676_v24 = vshrl.u32 %v1445_v4, %v1671_v50 }
  0xaf   :  { %v394_v57 = vmul.u32 %v392_v44, %v390_v28  ;;  %v395_v60 = vmul.u32 %v393_v45, %v390_v28  ;;  %v1680_v62 = vmul.u32 %v392_v44, %v391_v39  ;;  %v397_v5 = vmul.u32 %v393_v45, %v391_v39 }
  0xb0   :  { %v1696_v22 = vsub.s32 32, %v1689_v11  ;;  %v1700_v23 = vshll.u32 %v1445_v4, %v1689_v11  ;;  %v377_v25 = vsel %vm373_vm4, %v357_v0, %v1630_v17  ;;  %v1707_v27 = vsub.s32 32, %v509_v13  ;;  %267 = vmatmul.f32.vlgmr.msrb.gmra.mxu3 %v234_v58 }
  0xb1   :  { %v398_v6 = vshll.u32 %v395_v60, 16  ;;  %v400_v15 = vshll.u32 %v1680_v62, 16  ;;  %v416_v19 = vmul.u32 %v414_v9, %v390_v28  ;;  %v418_v31 = vmul.u32 %v414_v9, %v391_v39 }
  0xb2   :  { %v1711_v33 = vshrl.u32 %v1446_v12, %v1696_v22  ;;  %v420_v34 = vshll.u32 %v1686_v10, 16  ;;  %v379_v35 = vsel %vm375_vm6, %v1632_v18, %v378_v20  ;;  %v524_v36 = vshll.u32 %v1445_v4, %v509_v13 }
  0xb3   :  { %vm402_vm10 = vc.u32 %v394_v57, %v398_v6  ;;  %v404_v16 = vadd.s32 %v398_v6, %v394_v57  ;;  %v525_v17 = vshrl.u32 %v1446_v12, %v1707_v27  ;;  %v419_v37 = vmul.u32 %v415_v53, %v391_v39 }
  0xb4   :  { %v403_v21 = vsel %vm402_vm10, 1, %v1440_v1  ;;  %v834_v28 = vor.u32 %v1711_v33, %v1700_v23  ;;  %v399_v40 = vshrl.u32 %v395_v60, 16  ;;  %v1723_v43 = vor.u32 %v676_v24, %v675_v52 }
  0xb5   :  { %v405_v26 = vadd.s32 %v403_v21, %v397_v5  ;;  %vm406_vm11 = vc.u32 %v404_v16, %v400_v15  ;;  %v679_v44 = vshrl.u32 %v1446_v12, %v1671_v50  ;;  %v1727_v45 = vshrl.u32 %v507_v8, 5 }
  0xb6   :  { %v407_v42 = vsel %vm406_vm11, 1, %v1440_v1  ;;  %v521_v46 = vshll.u32 %v1444_v2, %v509_v13  ;;  %v522_v48 = vshrl.u32 %v1445_v4, %v1707_v27  ;;  %v422_v39 = vshll.u32 %v418_v31, 16 }
  0xb7   :  { %v409_v18 = vadd.s32 %v407_v42, %v405_v26  ;;  %vm424_vm12 = vc.u32 %v416_v19, %v420_v34  ;;  %v380_v49 = vsel %vm374_vm5, %v377_v25, %v379_v35  ;;  %v526_v53 = vor.u32 %v525_v17, %v524_v36 }
  0xb8   :  { %v401_v52 = vshrl.u32 %v1680_v62, 16  ;;  %v425_v57 = vsel %vm424_vm12, 1, %v1440_v1  ;;  %v426_v12 = vadd.s32 %v420_v34, %v416_v19  ;;  %v502_v3 = vand.u32 8388607, %v495_v54 }
  0xb9   :  { %v410_v60 = vadd.s32 %v409_v18, %v399_v40  ;;  %v427_v0 = vadd.s32 %v425_v57, %v419_v37  ;;  %vm530_vm13 = vcmp.lt.s32.totalorder %v1727_v45, 4  ;;  %v512_v5 = vshll.u32 %v1441_v59, %v509_v13 }
  0xba   :  { %v513_v6 = vshrl.u32 %v1442_v61, %v1707_v27  ;;  %v515_v55 = vshll.u32 %v1442_v61, %v509_v13  ;;  %v523_v8 = vor.u32 %v522_v48, %v521_v46  ;;  %v421_v62 = vshrl.u32 %v1686_v10, 16 }
  0xbb   :  { %vm428_vm14 = vc.u32 %v426_v12, %v422_v39  ;;  %v516_v9 = vshrl.u32 %v1443_v63, %v1707_v27  ;;  %v423_v15 = vshrl.u32 %v418_v31, 16  ;;  %v503_v58 = vor.u32 8388608, %v502_v3 }
  0xbc   :  { %v429_v16 = vsel %vm428_vm14, 1, %v1440_v1  ;;  %v1747_v20 = vor.u32 %v513_v6, %v512_v5  ;;  %v540_v21 = vsel %vm530_vm13, %v526_v53, 1326507024  ;;  %v1751_v24 = vadd.s32 %v410_v60, %v401_v52 }
  0xbd   :  { %v1753_v25 = vadd.s32 %v426_v12, %v422_v39  ;;  %v431_v26 = vadd.s32 %v429_v16, %v427_v0  ;;  %v1755_v19 = vor.u32 %v516_v9, %v515_v55  ;;  %v518_v10 = vshll.u32 %v1443_v63, %v509_v13 }
  0xbe   :  { %v519_v31 = vshrl.u32 %v1444_v2, %v1707_v27  ;;  %vm527_vm15 = vcmp.lt.s32.totalorder %v1727_v45, 1  ;;  %v536_v34 = vsel %vm530_vm13, %v523_v8, 920167782  ;;  %vm528_vm2 = vcmp.lt.s32.totalorder %v1727_v45, 2 }
  0xbf   :  { %v432_v35 = vadd.s32 %v431_v26, %v421_v62  ;;  %vm529_vm3 = vcmp.lt.s32.totalorder %v1727_v45, 3  ;;  %v535_v17 = vsel %vm527_vm15, %v1747_v20, %v1755_v19  ;;  %v1771_v37 = vshll.u32 %v503_v58, 8 }
  0xc0   :  { %v520_v36 = vor.u32 %v519_v31, %v518_v10  ;;  %v541_v13 = vsel %vm529_vm3, %v523_v8, %v540_v21  ;;  %v680_v40 = vor.u32 %v679_v44, %v1678_v56  ;;  %vm684_vm4 = vcmp.lt.s32.totalorder %v1666_v41, 4 }
  0xc1   :  { %v434_v42 = vmul.u32 %v1625_v14, %v380_v49  ;;  %v433_v18 = vadd.s32 %v432_v35, %v423_v15  ;;  %vm436_vm5 = vc.u32 %v1751_v24, %v1753_v25  ;;  %v544_v39 = vand.u32 65535, %v1771_v37 }
  0xc2   :  { %v537_v46 = vsel %vm529_vm3, %v520_v36, %v536_v34  ;;  %v539_v48 = vsel %vm527_vm15, %v1755_v19, %v520_v36  ;;  %v649_v44 = vand.u32 2147483647, %v1571_v29  ;;  %v1792_v49 = vsel %vm684_vm4, %v1723_v43, 920167782 }
  0xc3   :  { %v437_v53 = vadd.s32 1, %v433_v18  ;;  %v538_v56 = vsel %vm528_vm2, %v535_v17, %v537_v46  ;;  %v542_v14 = vsel %vm528_vm2, %v539_v48, %v541_v13  ;;  %v545_v52 = vshrl.u32 %v1771_v37, 16 }
  0xc4   :  { %v546_v57 = vand.u32 65535, %v542_v14  ;;  %v547_v60 = vshrl.u32 %v542_v14, 16  ;;  %v1797_v12 = vsel %vm684_vm4, %v680_v40, 1326507024  ;;  %v568_v3 = vand.u32 65535, %v538_v56 }
  0xc5   :  { %v438_v0 = vsel %vm436_vm5, %v437_v53, %v433_v18  ;;  %v569_v5 = vshrl.u32 %v538_v56, 16  ;;  %v1800_v9 = vshrl.u32 %v1684_v7, 5  ;;  %v1804_v34 = vshll.u32 %v1444_v2, %v1689_v11 }
  0xc6   :  { %v439_v6 = vadd.s32 %v438_v0, %v434_v42  ;;  %v548_v55 = vmul.u32 %v546_v57, %v544_v39  ;;  %v549_v8 = vmul.u32 %v547_v60, %v544_v39  ;;  %v550_v62 = vmul.u32 %v546_v57, %v545_v52 }
  0xc7   :  { %v570_v15 = vmul.u32 %v568_v3, %v544_v39  ;;  %v571_v16 = vmul.u32 %v569_v5, %v544_v39  ;;  %v572_v58 = vmul.u32 %v568_v3, %v545_v52  ;;  %v551_v26 = vmul.u32 %v547_v60, %v545_v52 }
  0xc8   :  { %v440_v21 = vadd.s32 536870912, %v439_v6  ;;  %v552_v10 = vshll.u32 %v549_v8, 16  ;;  %v554_v31 = vshll.u32 %v550_v62, 16  ;;  %v511_v35 = vshrl.u32 %v1441_v59, %v1707_v27 }
  0xc9   :  { %v573_v17 = vmul.u32 %v569_v5, %v545_v52  ;;  %v574_v13 = vshll.u32 %v571_v16, 16  ;;  %v576_v42 = vshll.u32 %v572_v58, 16  ;;  %v532_v18 = vsel %vm530_vm13, %v520_v36, 2102212464 }
  0xca   :  { %v1808_v40 = vshrl.u32 %v440_v21, 30  ;;  %vm556_vm6 = vc.u32 %v548_v55, %v552_v10  ;;  %v558_v7 = vadd.s32 %v552_v10, %v548_v55  ;;  %v553_v53 = vshrl.u32 %v549_v8, 16 }
  0xcb   :  { %v557_v46 = vsel %vm556_vm6, 1, %v1440_v1  ;;  %vm578_vm7 = vc.u32 %v570_v15, %v574_v13  ;;  %v580_v48 = vadd.s32 %v574_v13, %v570_v15  ;;  %v531_v27 = vsel %vm527_vm15, %v511_v35, %v1747_v20 }
  0xcc   :  { %v442_v39 = vshll.u32 %v1808_v40, 30  ;;  %v559_v56 = vadd.s32 %v557_v46, %v551_v26  ;;  %vm560_vm8 = vc.u32 %v558_v7, %v554_v31  ;;  %v579_v52 = vsel %vm578_vm7, 1, %v1440_v1 }
  0xcd   :  { %v561_v14 = vsel %vm560_vm8, 1, %v1440_v1  ;;  %vm582_vm9 = vc.u32 %v580_v48, %v576_v42  ;;  %v533_v36 = vsel %vm529_vm3, %v1755_v19, %v532_v18  ;;  %v581_v0 = vadd.s32 %v579_v52, %v573_v17 }
  0xce   :  { %v1819_v57 = vsub.s32 %v439_v6, %v442_v39  ;;  %v563_v60 = vadd.s32 %v561_v14, %v559_v56  ;;  %v555_v3 = vshrl.u32 %v550_v62, 16  ;;  %v575_v5 = vshrl.u32 %v571_v16, 16 }
  0xcf   :  { %v583_v55 = vsel %vm582_vm9, 1, %v1440_v1  ;;  %v656_v20 = vand.u32 8388607, %v649_v44  ;;  %v666_v6 = vshll.u32 %v1441_v59, %v1655_v32  ;;  %vm343_vm11 = vcmp.lt.s32.totalorder %v1573_v30, 0 }
  0xd0   :  { %vm444_vm10 = vcmp.lt.s32.totalorder %v1819_v57, 0  ;;  %v445_v8 = vsub.s32 0, %v1819_v57  ;;  %v564_v15 = vadd.s32 %v563_v60, %v553_v53  ;;  %v534_v19 = vsel %vm528_vm2, %v531_v27, %v533_v36 }
  0xd1   :  { %v577_v62 = vshrl.u32 %v572_v58, 16  ;;  %v585_v16 = vadd.s32 %v583_v55, %v581_v0  ;;  %v667_v21 = vshrl.u32 %v1442_v61, %v1671_v50  ;;  %v1837_v10 = vadd.s32 %v580_v48, %v576_v42 }
  0xd2   :  { %v446_v26 = vsel %vm444_vm10, %v445_v8, %v1819_v57  ;;  %v669_v31 = vshll.u32 %v1442_v61, %v1655_v32  ;;  %v670_v35 = vshrl.u32 %v1443_v63, %v1671_v50  ;;  %v830_v17 = vshrl.u32 %v1445_v4, %v1696_v22 }
  0xd3   :  { %v447_v45 = vclz %v446_v26  ;;  %v1845_v13 = vadd.s32 %v564_v15, %v555_v3  ;;  %v586_v58 = vadd.s32 %v585_v16, %v575_v5  ;;  %vm1849_vm12 = vcmp.le.f32.partialorder %v341_v38, 0.7853982 }
  0xd4   :  { %v435_v42 = vadd.s32 %v1753_v25, %v1751_v24  ;;  %v588_v18 = vmul.u32 %v1771_v37, %v534_v19  ;;  %v657_v46 = vor.u32 8388608, %v656_v20  ;;  %v672_v48 = vshll.u32 %v1443_v63, %v1655_v32 }
  0xd5   :  { %v1205_v4 = vadd.s32 4294967294, %v447_v45  ;;  %v465_v39 = vsub.s32 4, %v1808_v40  ;;  %v587_v53 = vadd.s32 %v586_v58, %v577_v62  ;;  %v668_v56 = vor.u32 %v667_v21, %v666_v6 }
  0xd6   :  { %vm590_vm13 = vc.u32 %v1845_v13, %v1837_v10  ;;  %v671_v38 = vor.u32 %v670_v35, %v669_v31  ;;  %v673_v27 = vshrl.u32 %v1444_v2, %v1671_v50  ;;  %vm683_vm14 = vcmp.lt.s32.totalorder %v1666_v41, 3 }
  0xd7   :  { %vm1206_vm15 = vcmp.lt.s32.totalorder %v1205_v4, 0  ;;  %v591_v24 = vadd.s32 1, %v587_v53  ;;  %vm681_vm2 = vcmp.lt.s32.totalorder %v1666_v41, 1  ;;  %vm682_vm3 = vcmp.lt.s32.totalorder %v1666_v41, 2 }
  0xd8   :  { %v450_v32 = vsel %vm1206_vm15, 0, %v1205_v4  ;;  %v674_v25 = vor.u32 %v673_v27, %v672_v48  ;;  %v695_v37 = vsel %vm683_vm14, %v1723_v43, %v1797_v12  ;;  %v1870_v14 = vshll.u32 %v657_v46, 8 }
  0xd9   :  { %v451_v52 = vsub.s32 32, %v450_v32  ;;  %v452_v36 = vshll.u32 %v1819_v57, %v450_v32  ;;  %v455_v60 = vsub.s32 4294967266, %v450_v32  ;;  %v592_v0 = vsel %vm590_vm13, %v591_v24, %v587_v53 }
  0xda   :  { %v1874_v3 = vor.u32 %v830_v17, %v1804_v34  ;;  %vm838_vm5 = vcmp.lt.s32.totalorder %v1800_v9, 4  ;;  %v593_v5 = vadd.s32 %v592_v0, %v588_v18  ;;  %v693_v55 = vsel %vm681_vm2, %v671_v38, %v674_v25 }
  0xdb   :  { %v453_v20 = vshrl.u32 %v435_v42, %v451_v52  ;;  %v456_v8 = vadd.s32 127, %v455_v60  ;;  %v689_v43 = vsel %vm681_vm2, %v668_v56, %v671_v38  ;;  %v691_v12 = vsel %vm683_vm14, %v674_v25, %v1792_v49 }
  0xdc   :  { %v466_v34 = vsel %vm343_vm11, %v465_v39, %v1808_v40  ;;  %v594_v57 = vadd.s32 536870912, %v593_v5  ;;  %v696_v15 = vsel %vm682_vm3, %v693_v55, %v695_v37  ;;  %v698_v6 = vand.u32 65535, %v1870_v14 }
  0xdd   :  { %v454_v19 = vor.u32 %v453_v20, %v452_v36  ;;  %v457_v62 = vshll.u32 %v456_v8, 23  ;;  %v665_v16 = vshrl.u32 %v1441_v59, %v1671_v50  ;;  %v699_v21 = vshrl.u32 %v1870_v14, 16 }
  0xde   :  { %v1893_v26 = vshrl.u32 %v594_v57, 30  ;;  %v692_v49 = vsel %vm682_vm3, %v689_v43, %v691_v12  ;;  %v700_v31 = vand.u32 65535, %v696_v15  ;;  %v701_v40 = vshrl.u32 %v696_v15, 16 }
  0xdf   :  { %v1900_v35 = vsel %vm838_vm5, %v1874_v3, 920167782  ;;  %v458_v17 = vor.u32 4788187, %v457_v62  ;;  %v461_v45 = vcvt.s32.f32 %v454_v19  ;;  %v468_v58 = vsel %vm1849_vm12, 0, %v466_v34 }
  0xe0   :  { %v596_v50 = vshll.u32 %v1893_v26, 30  ;;  %v686_v42 = vsel %vm684_vm4, %v674_v25, 2102212464  ;;  %v702_v18 = vmul.u32 %v700_v31, %v698_v6  ;;  %v703_v46 = vmul.u32 %v701_v40, %v698_v6 }
  0xe1   :  { %v1912_v48 = vsel %vm838_vm5, %v834_v28, 1326507024  ;;  %v459_v4 = vand.u32 2147483647, %v458_v17  ;;  %v704_v39 = vmul.u32 %v700_v31, %v699_v21  ;;  %v723_v53 = vshrl.u32 %v692_v49, 16 }
  0xe2   :  { %v1914_v27 = vand.u32 3, %v468_v58  ;;  %v597_v24 = vsub.s32 %v593_v5, %v596_v50  ;;  %v685_v32 = vsel %vm681_vm2, %v665_v16, %v668_v56  ;;  %v706_v37 = vshll.u32 %v703_v46, 16 }
  0xe3   :  { %v462_v25 = vmul.f32 %v461_v45, %v459_v4  ;;  %v687_v52 = vsel %vm683_vm14, %v671_v38, %v686_v42  ;;  %v705_v36 = vmul.u32 %v701_v40, %v699_v21  ;;  %v708_v23 = vshll.u32 %v704_v39, 16 }
  0xe4   :  { %vm598_vm4 = vcmp.lt.s32.totalorder %v597_v24, 0  ;;  %v599_v33 = vsub.s32 0, %v597_v24  ;;  %vm710_vm6 = vc.u32 %v702_v18, %v706_v37  ;;  %v722_v28 = vand.u32 65535, %v692_v49 }
  0xe5   :  { %v463_v60 = vxor.u32 2147483648, %v462_v25  ;;  %v711_v0 = vsel %vm710_vm6, 1, %v1440_v1  ;;  %v712_v55 = vadd.s32 %v706_v37, %v702_v18  ;;  %v725_v20 = vmul.u32 %v723_v53, %v698_v6 }
  0xe6   :  { %v589_v5 = vadd.s32 %v1837_v10, %v1845_v13  ;;  %v600_v56 = vsel %vm598_vm4, %v599_v33, %v597_v24  ;;  %v1925_v8 = vsel %vm682_vm3, %v685_v32, %v687_v52  ;;  %v707_v38 = vshrl.u32 %v703_v46, 16 }
  0xe7   :  { %v464_v43 = vsel %vm343_vm11, %v463_v60, %v462_v25  ;;  %v601_v12 = vclz %v600_v56  ;;  %v713_v34 = vadd.s32 %v711_v0, %v705_v36  ;;  %vm714_vm7 = vc.u32 %v712_v55, %v708_v23 }
  0xe8   :  { %v1932_v57 = vsel %vm1849_vm12, %v1573_v30, %v464_v43  ;;  %v715_v15 = vsel %vm714_vm7, 1, %v1440_v1  ;;  %v724_v10 = vmul.u32 %v722_v28, %v698_v6  ;;  %v726_v13 = vmul.u32 %v722_v28, %v699_v21 }
  0xe9   :  { %v469_v41 = vmul.f32 %v1932_v57, %v1932_v57  ;;  %v1208_v19 = vadd.s32 4294967294, %v601_v12  ;;  %v717_v62 = vadd.s32 %v715_v15, %v713_v34  ;;  %v728_v16 = vshll.u32 %v725_v20, 16 }
  0xea   :  { %v709_v49 = vshrl.u32 %v704_v39, 16  ;;  %v727_v31 = vmul.u32 %v723_v53, %v699_v21  ;;  %v729_v40 = vshrl.u32 %v725_v20, 16  ;;  %v730_v17 = vshll.u32 %v726_v13, 16 }
  0xeb   :  { %v470_v45 = vmul.f32 -0.001358992, %v469_v41  ;;  %v477_v58 = vmul.f32 -0.00019511016, %v469_v41  ;;  %vm1209_vm8 = vcmp.lt.s32.totalorder %v1208_v19, 0  ;;  %v718_v7 = vadd.s32 %v717_v62, %v707_v38 }
  0xec   :  { %v604_v50 = vsel %vm1209_vm8, 0, %v1208_v19  ;;  %vm732_vm9 = vc.u32 %v724_v10, %v728_v16  ;;  %v734_v42 = vadd.s32 %v728_v16, %v724_v10  ;;  %v803_v6 = vand.u32 2147483647, %v1588_v47 }
  0xed   :  { %v471_v18 = vadd.f32 0.041655596, %v470_v45  ;;  %v478_v46 = vadd.f32 0.008332121, %v477_v58  ;;  %v605_v4 = vsub.s32 32, %v604_v50  ;;  %v606_v32 = vshll.u32 %v597_v24, %v604_v50 }
  0xee   :  { %v609_v37 = vsub.s32 4294967266, %v604_v50  ;;  %v1938_v25 = vadd.s32 %v718_v7, %v709_v49  ;;  %v733_v21 = vsel %vm732_vm9, 1, %v1440_v1  ;;  %vm736_vm10 = vc.u32 %v734_v42, %v730_v17 }
  0xef   :  { %v472_v39 = vmul.f32 %v471_v18, %v469_v41  ;;  %v479_v53 = vmul.f32 %v478_v46, %v469_v41  ;;  %v607_v52 = vshrl.u32 %v589_v5, %v605_v4  ;;  %v735_v36 = vadd.s32 %v733_v21, %v727_v31 }
  0xf0   :  { %v610_v23 = vadd.s32 127, %v609_v37  ;;  %v731_v33 = vshrl.u32 %v726_v13, 16  ;;  %v737_v28 = vsel %vm736_vm10, 1, %v1440_v1  ;;  %v1942_v60 = vadd.s32 %v734_v42, %v730_v17 }
  0xf1   :  { %v473_v0 = vadd.f32 -0.4999988, %v472_v39  ;;  %v480_v55 = vadd.f32 -0.16666654, %v479_v53  ;;  %v608_v20 = vor.u32 %v607_v52, %v606_v32  ;;  %v739_v24 = vadd.s32 %v737_v28, %v735_v36 }
  0xf2   :  { %vm497_vm11 = vcmp.lt.s32.totalorder %v1593_v51, 0  ;;  %v611_v56 = vshll.u32 %v610_v23, 23  ;;  %v742_v38 = vmul.u32 %v1870_v14, %v1925_v8  ;;  %v810_v5 = vand.u32 8388607, %v803_v6 }
  0xf3   :  { %v474_v43 = vmul.f32 %v473_v0, %v469_v41  ;;  %v481_v12 = vmul.f32 %v480_v55, %v469_v41  ;;  %vm486_vm12 = vcmp.lt.s32.totalorder %v1914_v27, 2  ;;  %v740_v34 = vadd.s32 %v739_v24, %v729_v40 }
  0xf4   :  { %vm744_vm13 = vc.u32 %v1938_v25, %v1942_v60  ;;  %vm484_vm14 = vweird.f32 %v1573_v30  ;;  %vm1955_vm15 = vcmp.le.f32.partialorder %v495_v54, 0.7853982  ;;  %v612_v14 = vor.u32 4788187, %v611_v56 }
  0xf5   :  { %v615_v8 = vcvt.s32.f32 %v608_v20  ;;  %v820_v10 = vshll.u32 %v1441_v59, %v1689_v11  ;;  %v821_v13 = vshrl.u32 %v1442_v61, %v1696_v22  ;;  %v475_v41 = vadd.f32 1.0, %v474_v43 }
  0xf6   :  { %v482_v19 = vadd.f32 1.0, %v481_v12  ;;  %v741_v62 = vadd.s32 %v740_v34, %v731_v33  ;;  %v823_v16 = vshll.u32 %v1442_v61, %v1689_v11  ;;  %v613_v49 = vand.u32 2147483647, %v612_v14 }
  0xf7   :  { %v824_v54 = vshrl.u32 %v1443_v63, %v1696_v22  ;;  %v826_v31 = vshll.u32 %v1443_v63, %v1689_v11  ;;  %v827_v40 = vshrl.u32 %v1444_v2, %v1696_v22  ;;  %vm487_vm2 = vcmp.eq.s32.totalorder %v1914_v27, 0 }
  0xf8   :  { %v483_v17 = vmul.f32 %v482_v19, %v1932_v57  ;;  %v491_v45 = vxor.u32 2147483648, %v475_v41  ;;  %v745_v58 = vadd.s32 1, %v741_v62  ;;  %vm490_vm3 = vcmp.eq.s32.totalorder %v1914_v27, 2 }
  0xf9   :  { %vm969_vm4 = vcmask 523264   ;;  %v616_v61 = vmul.f32 %v615_v8, %v613_v49  ;;  %v619_v7 = vsub.s32 4, %v1893_v26  ;;  %v811_v11 = vor.u32 8388608, %v810_v5 }
  0xfa   :  { %v488_v50 = vxor.u32 2147483648, %v483_v17  ;;  %v746_v63 = vsel %vm744_vm13, %v745_v58, %v741_v62  ;;  %v1978_v42 = vor.u32 %v821_v13, %v820_v10  ;;  %v1980_v18 = vor.u32 %v824_v54, %v823_v16 }
  0xfb   :  { %v617_v2 = vxor.u32 2147483648, %v616_v61  ;;  %v747_v57 = vadd.s32 %v746_v63, %v742_v38  ;;  %v1982_v46 = vor.u32 %v827_v40, %v826_v31  ;;  %v492_v32 = vsel %vm490_vm3, %v491_v45, %v483_v17 }
  0xfc   :  { %v489_v4 = vsel %vm487_vm2, %v475_v41, %v488_v50  ;;  %vm835_vm6 = vcmp.lt.s32.totalorder %v1800_v9, 1  ;;  %vm837_vm7 = vcmp.lt.s32.totalorder %v1800_v9, 3  ;;  %v620_v39 = vsel %vm497_vm11, %v619_v7, %v1893_v26 }
  0xfd   :  { %v493_v37 = vsel %vm486_vm12, %v489_v4, %v492_v32  ;;  %v618_v21 = vsel %vm497_vm11, %v617_v2, %v616_v61  ;;  %v748_v53 = vadd.s32 536870912, %v747_v57  ;;  %vm836_vm8 = vcmp.lt.s32.totalorder %v1800_v9, 2 }
  0xfe   :  { %v494_v52 = vsel %vm484_vm14, nan, %v493_v37  ;;  %v621_v36 = vsel %vm1955_vm15, %v1593_v51, %v618_v21  ;;  %v847_v26 = vsel %vm835_vm6, %v1980_v18, %v1982_v46  ;;  %v849_v30 = vsel %vm837_vm7, %v1874_v3, %v1912_v48 }
  0xff   :  { %1216 = vmatmul.msk.f32.vlgmr.msrb.gmra.mxu1 %vm969_vm4, %v494_v52  ;;  %v623_v27 = vmul.f32 %v621_v36, %v621_v36  ;;  %v2000_v23 = vshrl.u32 %v748_v53, 30  ;;  %v622_v33 = vsel %vm1955_vm15, 0, %v620_v39  ;;  %v843_v28 = vsel %vm835_vm6, %v1978_v42, %v1980_v18 }
 0x100   :  { %v845_v0 = vsel %vm837_vm7, %v1982_v46, %v1900_v35  ;;  %v2020_v55 = vshll.u32 %v811_v11, 8  ;;  %v850_v3 = vsel %vm836_vm8, %v847_v26, %v849_v30  ;;  %v639_v15 = vand.u32 3, %v622_v33 }
 0x101   :  { %v624_v20 = vmul.f32 -0.001358992, %v623_v27  ;;  %v631_v24 = vmul.f32 -0.00019511016, %v623_v27  ;;  %v750_v56 = vshll.u32 %v2000_v23, 30  ;;  %v854_v5 = vand.u32 65535, %v850_v3 }
 0x102   :  { %v852_v48 = vand.u32 65535, %v2020_v55  ;;  %v853_v38 = vshrl.u32 %v2020_v55, 16  ;;  %v846_v35 = vsel %vm836_vm8, %v843_v28, %v845_v0  ;;  %v855_v14 = vshrl.u32 %v850_v3, 16 }
 0x103   :  { %v625_v43 = vadd.f32 0.041655596, %v624_v20  ;;  %v632_v12 = vadd.f32 0.008332121, %v631_v24  ;;  %v751_v34 = vsub.s32 %v747_v57, %v750_v56  ;;  %v876_v62 = vand.u32 65535, %v846_v35 }
 0x104   :  { %v2029_v8 = vmul.u32 %v854_v5, %v853_v38  ;;  %v857_v19 = vmul.u32 %v855_v14, %v852_v48  ;;  %v856_v31 = vmul.u32 %v854_v5, %v852_v48  ;;  %vm641_vm10 = vcmp.eq.s32.totalorder %v639_v15, 0 }
 0x105   :  { %v626_v10 = vmul.f32 %v625_v43, %v623_v27  ;;  %v633_v13 = vmul.f32 %v632_v12, %v623_v27  ;;  %vm752_vm9 = vcmp.lt.s32.totalorder %v751_v34, 0  ;;  %v753_v41 = vsub.s32 0, %v751_v34 }
 0x106   :  { %vm644_vm11 = vcmp.eq.s32.totalorder %v639_v15, 2  ;;  %v743_v40 = vadd.s32 %v1942_v60, %v1938_v25  ;;  %v819_v45 = vshrl.u32 %v1441_v59, %v1696_v22  ;;  %v859_v58 = vmul.u32 %v855_v14, %v853_v38 }
 0x107   :  { %v627_v16 = vadd.f32 -0.4999988, %v626_v10  ;;  %v634_v49 = vadd.f32 -0.16666654, %v633_v13  ;;  %v754_v54 = vsel %vm752_vm9, %v753_v41, %v751_v34  ;;  %vm640_vm12 = vcmp.lt.s32.totalorder %v639_v15, 2 }
 0x108   :  { %v755_v17 = vclz %v754_v54  ;;  %v860_v50 = vshll.u32 %v857_v19, 16  ;;  %v862_v63 = vshll.u32 %v2029_v8, 16  ;;  %vm638_vm13 = vweird.f32 %v1593_v51 }
 0x109   :  { %v628_v61 = vmul.f32 %v627_v16, %v623_v27  ;;  %v635_v7 = vmul.f32 %v634_v49, %v623_v27  ;;  %v861_v2 = vshrl.u32 %v857_v19, 16  ;;  %v877_v57 = vshrl.u32 %v846_v35, 16 }
 0x10a   :  { %v1211_v11 = vadd.s32 4294967294, %v755_v17  ;;  %v878_v4 = vmul.u32 %v876_v62, %v852_v48  ;;  %vm864_vm14 = vc.u32 %v856_v31, %v860_v50  ;;  %v866_v25 = vadd.s32 %v860_v50, %v856_v31 }
 0x10b   :  { %v629_v32 = vadd.f32 1.0, %v628_v61  ;;  %v636_v37 = vadd.f32 1.0, %v635_v7  ;;  %v865_v59 = vsel %vm864_vm14, 1, %v1440_v1  ;;  %v879_v22 = vmul.u32 %v877_v57, %v852_v48 }
 0x10c   :  { %vm1212_vm15 = vcmp.lt.s32.totalorder %v1211_v11, 0  ;;  %v880_v60 = vmul.u32 %v876_v62, %v853_v38  ;;  %v867_v52 = vadd.s32 %v865_v59, %v859_v58  ;;  %vm868_vm2 = vc.u32 %v866_v25, %v862_v63 }
 0x10d   :  { %v637_v21 = vmul.f32 %v636_v37, %v621_v36  ;;  %v645_v39 = vxor.u32 2147483648, %v629_v32  ;;  %v758_v53 = vsel %vm1212_vm15, 0, %v1211_v11  ;;  %v863_v28 = vshrl.u32 %v2029_v8, 16 }
 0x10e   :  { %v759_v27 = vsub.s32 32, %v758_v53  ;;  %v760_v26 = vshll.u32 %v751_v34, %v758_v53  ;;  %v763_v30 = vsub.s32 4294967266, %v758_v53  ;;  %v869_v0 = vsel %vm868_vm2, 1, %v1440_v1 }
 0x10f   :  { %v642_v33 = vxor.u32 2147483648, %v637_v21  ;;  %v882_v20 = vshll.u32 %v879_v22, 16  ;;  %v871_v3 = vadd.s32 %v869_v0, %v867_v52  ;;  %v881_v5 = vmul.u32 %v877_v57, %v853_v38 }
 0x110   :  { %v761_v24 = vshrl.u32 %v743_v40, %v759_v27  ;;  %v764_v56 = vadd.s32 127, %v763_v30  ;;  %v646_v36 = vsel %vm644_vm11, %v645_v39, %v637_v21  ;;  %v884_v43 = vshll.u32 %v880_v60, 16 }
 0x111   :  { %v643_v48 = vsel %vm641_vm10, %v629_v32, %v642_v33  ;;  %vm886_vm3 = vc.u32 %v878_v4, %v882_v20  ;;  %v872_v14 = vadd.s32 %v871_v3, %v861_v2  ;;  %v840_v10 = vsel %vm838_vm5, %v1982_v46, 2102212464 }
 0x112   :  { %v647_v12 = vsel %vm640_vm12, %v643_v48, %v646_v36  ;;  %v762_v34 = vor.u32 %v761_v24, %v760_v26  ;;  %v765_v35 = vshll.u32 %v764_v56, 23  ;;  %v887_v38 = vsel %vm886_vm3, 1, %v1440_v1 }
 0x113   :  { %v648_v8 = vsel %vm638_vm13, nan, %v647_v12  ;;  %v888_v13 = vadd.s32 %v882_v20, %v878_v4  ;;  %v873_v62 = vadd.s32 %v872_v14, %v863_v28  ;;  %v889_v15 = vadd.s32 %v887_v38, %v881_v5 }
 0x114   :  { %1217 = vmatmul.msk.f32.gmra.mxu1 %vm969_vm4, %v648_v8  ;;  %v766_v41 = vor.u32 4788187, %v765_v35  ;;  %v769_v19 = vcvt.s32.f32 %v762_v34  ;;  %v883_v16 = vshrl.u32 %v879_v22, 16  ;;  %v839_v51 = vsel %vm835_vm6, %v819_v45, %v1978_v42 }
 0x115   :  { %vm890_vm9 = vc.u32 %v888_v13, %v884_v43  ;;  %v892_v49 = vadd.s32 %v888_v13, %v884_v43  ;;  %v841_v46 = vsel %vm837_vm7, %v1980_v18, %v840_v10  ;;  %v885_v40 = vshrl.u32 %v880_v60, 16 }
 0x116   :  { %v767_v54 = vand.u32 2147483647, %v766_v41  ;;  %v891_v31 = vsel %vm890_vm9, 1, %v1440_v1  ;;  %vm651_vm10 = vcmp.lt.s32.totalorder %v1571_v29, 0  ;;  %v842_v7 = vsel %vm836_vm8, %v839_v51, %v841_v46  ;;  %v285_v46 = vld [vmem:[#allocation9 + $0x68] sm:$0xff] }
 0x117   :  { %v893_v17 = vadd.s32 %v891_v31, %v889_v15  ;;  %v897_v58 = vadd.s32 %v892_v49, %v873_v62  ;;  %vm898_vm5 = vc.u32 %v873_v62, %v892_v49  ;;  %vm2062_vm6 = vcmp.le.f32.partialorder %v649_v44, 0.7853982  ;;  %v286_v49 = vld [vmem:[#allocation9 + $0x70] sm:$0xff]  ;;  %v284_v31 = vld [vmem:[#allocation9 + $0x60] sm:$0xff] }
 0x118   :  { %v770_v61 = vmul.f32 %v769_v19, %v767_v54  ;;  %v896_v63 = vmul.u32 %v2020_v55, %v842_v7  ;;  %v773_v37 = vsub.s32 4, %v2000_v23  ;;  %vm792_vm13 = vweird.f32 %v1571_v29  ;;  %v1044_v7 = vld [vmem:[%s2144_s2 + $0x18] sm:$0xff] }
 0x119   :  { %v894_v50 = vadd.s32 %v893_v17, %v883_v16  ;;  %v287_v16 = vld [vmem:[#allocation9 + $0x78] sm:$0xff]  ;;  %vm805_vm15 = vcmp.lt.s32.totalorder %v1588_v47, 0  ;;  %vm2086_vm2 = vcmp.le.f32.partialorder %v803_v6, 0.7853982 }
 0x11a   :  { %v771_v18 = vxor.u32 2147483648, %v770_v61  ;;  %v774_v55 = vsel %vm651_vm10, %v773_v37, %v2000_v23  ;;  %288 = vmatpush.msrb.mxu0 %v287_v16  ;;  %v283_v17 = vld [vmem:[#allocation9 + $0x58] sm:$0xff]  ;;  %v2104_v37 = vld [vmem:[%s2147_s5] sm:$0x7] }
 0x11b   :  { %v895_v45 = vadd.s32 %v894_v50, %v885_v40  ;;  %v776_v26 = vsel %vm2062_vm6, 0, %v774_v55  ;;  %v1036_v16 = vld [vmem:[#allocation11 + $0x58] sm:$0xff] }
 0x11c   :  { %v772_v1 = vsel %vm651_vm10, %v771_v18, %v770_v61  ;;  %v793_v56 = vand.u32 3, %v776_v26  ;;  %289 = vmatpush.msrb.mxu0 %v286_v49  ;;  %v281_v18 = vld [vmem:[#allocation9 + $0x48] sm:$0xff]  ;;  %vm946_vm10 = vweird.f32 %v1588_v47  ;;  %v1035_v49 = vld [vmem:[#allocation11 + $0x50] sm:$0xff] }
 0x11d   :  { %v775_v11 = vsel %vm2062_vm6, %v1571_v29, %v772_v1  ;;  %v899_v9 = vadd.s32 1, %v895_v45  ;;  %v2095_v1 = vpop.f32.mrf.mxu3 }
 0x11e   :  { %v777_v2 = vmul.f32 %v775_v11, %v775_v11  ;;  %vm795_vm8 = vcmp.eq.s32.totalorder %v793_v56, 0  ;;  %vm798_vm11 = vcmp.eq.s32.totalorder %v793_v56, 2  ;;  %vm794_vm12 = vcmp.lt.s32.totalorder %v793_v56, 2  ;;  %290 = vmatpush.msrb.mxu0 %v285_v46  ;;  %v1043_v46 = vld [vmem:[%s2144_s2 + $0x10] sm:$0xff] }
 0x11f   :  { %v900_v57 = vsel %vm898_vm5, %v899_v9, %v895_v45 }
 0x120   :  { %v778_v4 = vmul.f32 -0.001358992, %v777_v2  ;;  %v785_v32 = vmul.f32 -0.00019511016, %v777_v2  ;;  %v901_v44 = vadd.s32 %v900_v57, %v896_v63  ;;  %291 = vmatpush.msrb.mxu0 %v284_v31  ;;  %v1031_v31 = vld [vmem:[#allocation11 + $0x30] sm:$0xff] }
 0x122   :  { %v779_v25 = vadd.f32 0.041655596, %v778_v4  ;;  %v786_v59 = vadd.f32 0.008332121, %v785_v32  ;;  %v902_v22 = vadd.s32 536870912, %v901_v44  ;;  %292 = vmatpush.msrb.mxu0 %v283_v17  ;;  %v1030_v17 = vld [vmem:[#allocation11 + $0x28] sm:$0xff] }
 0x124   :  { %v780_v60 = vmul.f32 %v779_v25, %v777_v2  ;;  %v787_v21 = vmul.f32 %v786_v59, %v777_v2  ;;  %v2073_v39 = vshrl.u32 %v902_v22, 30  ;;  %v155_v25 = vperm.slane %v2104_v37, 1 }
 0x126   :  { %v781_v53 = vadd.f32 -0.4999988, %v780_v60  ;;  %v788_v52 = vadd.f32 -0.16666654, %v787_v21  ;;  %v904_v27 = vshll.u32 %v2073_v39, 30  ;;  %v927_v63 = vsub.s32 4, %v2073_v39  ;;  %v211_v60 = vpop.f32.mrf.mxu1 }
 0x127   :  { %v277_v21 = vld [vmem:[#allocation9 + $0x28] sm:$0xff] }
 0x128   :  { %v782_v30 = vmul.f32 %v781_v53, %v777_v2  ;;  %v789_v33 = vmul.f32 %v788_v52, %v777_v2  ;;  %v905_v28 = vsub.s32 %v901_v44, %v904_v27  ;;  %v279_v2 = vld [vmem:[#allocation9 + $0x38] sm:$0xff]  ;;  %v928_v32 = vsel %vm805_vm15, %v927_v63, %v2073_v39  ;;  %v278_v44 = vld [vmem:[#allocation9 + $0x30] sm:$0xff]  ;;  %v276_v39 = vld [vmem:[#allocation9 + $0x20] sm:$0xff] }
 0x129   :  { %v930_v55 = vsel %vm2086_vm2, 0, %v928_v32  ;;  %v212_v27 = vadd.f32 %v211_v60, %v155_v25 }
 0x12a   :  { %v783_v0 = vadd.f32 1.0, %v782_v30  ;;  %v790_v20 = vadd.f32 1.0, %v789_v33  ;;  %vm906_vm7 = vcmp.lt.s32.totalorder %v905_v28, 0  ;;  %v907_v24 = vsub.s32 0, %v905_v28 }
 0x12c   :  { %v791_v3 = vmul.f32 %v790_v20, %v775_v11  ;;  %v799_v5 = vxor.u32 2147483648, %v783_v0  ;;  %v908_v48 = vsel %vm906_vm7, %v907_v24, %v905_v28  ;;  %v280_v11 = vld [vmem:[#allocation9 + $0x40] sm:$0xff] }
 0x12d   :  { %v909_v36 = vclz %v908_v48 }
 0x12e   :  { %v796_v23 = vxor.u32 2147483648, %v791_v3  ;;  %v800_v34 = vsel %vm798_vm11, %v799_v5, %v791_v3  ;;  %v274_v3 = vld [vmem:[#allocation9 + $0x10] sm:$0xff] }
 0x12f   :  { %v1214_v43 = vadd.s32 4294967294, %v909_v36  ;;  %v273_v36 = vld [vmem:[#allocation9 + $0x8] sm:$0xff] }
 0x130   :  { %v797_v12 = vsel %vm795_vm8, %v783_v0, %v796_v23  ;;  %v275_v0 = vld [vmem:[#allocation9 + $0x18] sm:$0xff] }
 0x131   :  { %v801_v35 = vsel %vm794_vm12, %v797_v12, %v800_v34  ;;  %vm1215_vm14 = vcmp.lt.s32.totalorder %v1214_v43, 0  ;;  %v272_v34 = vld [vmem:[#allocation9] sm:$0xff] }
 0x132   :  { %v802_v14 = vsel %vm792_vm13, nan, %v801_v35  ;;  %v912_v8 = vsel %vm1215_vm14, 0, %v1214_v43 }
 0x133   :  { %1218 = vmatmul.msk.f32.gmra.mxu1 %vm969_vm4, %v802_v14  ;;  %v913_v10 = vsub.s32 32, %v912_v8  ;;  %v914_v38 = vshll.u32 %v905_v28, %v912_v8  ;;  %v917_v13 = vsub.s32 4294967266, %v912_v8  ;;  %v268_v33 = vpop.f32.mrf.mxu3  ;;  %v947_v28 = vand.u32 3, %v930_v55 }
 0x134   :  { %v269_v56 = vadd.f32 %v268_v33, %v212_v27 }
 0x135   :  { %v915_v41 = vshrl.u32 %v897_v58, %v913_v10  ;;  %v918_v19 = vadd.s32 127, %v917_v13  ;;  %v282_v58 = vld [vmem:[#allocation9 + $0x50] sm:$0xff]  ;;  %vm952_vm3 = vcmp.eq.s32.totalorder %v947_v28, 2  ;;  %vm949_vm9 = vcmp.eq.s32.totalorder %v947_v28, 0  ;;  %v1046_v10 = vld [vmem:[#allocation12 + $0x8] sm:$0xf] }
 0x136   :  { %293 = vmatpush.msrb.mxu0 %v282_v58  ;;  %v271_v12 = vmax.f32 %v269_v56, 0.0  ;;  %vm948_vm5 = vcmp.lt.s32.totalorder %v947_v28, 2  ;;  %1220 = vmatpush.msk.msra.mxu2 %vm164_vm0, %v1046_v10  ;;  %v1041_v13 = vld [vmem:[%s2144_s2] sm:$0xff]  ;;  %v1029_v58 = vld [vmem:[#allocation11 + $0x20] sm:$0xff]  ;;  %vm1168_vm0 = vcmask 130112  }
 0x137   :  { %v916_v62 = vor.u32 %v915_v41, %v914_v38  ;;  %v919_v15 = vshll.u32 %v918_v19, 23  ;;  %v1045_v38 = vld [vmem:[#allocation12] sm:$0xff]  ;;  %v1040_v41 = vld [vmem:[#allocation11 + $0x78] sm:$0xff]  ;;  %v1039_v19 = vld [vmem:[#allocation11 + $0x70] sm:$0xff] }
 0x138   :  { %294 = vmatpush.msrb.mxu0 %v281_v18  ;;  %1077 = vmatpush.msra.mxu2 %v1045_v38 }
 0x139   :  { %v920_v54 = vor.u32 4788187, %v919_v15  ;;  %v923_v51 = vcvt.s32.f32 %v916_v62  ;;  %1221 = vmatmul.msk.f32.vlgmr.msra.gmra.mxu2 %vm160_vm1, %v1041_v13  ;;  %v1037_v62 = vld [vmem:[#allocation11 + $0x60] sm:$0xff]  ;;  %v1042_v15 = vld [vmem:[%s2144_s2 + $0x8] sm:$0xff] }
 0x13a   :  { %295 = vmatpush.msrb.mxu0 %v280_v11  ;;  %1091 = vmatpush.msrb.mxu2 %v1040_v41 }
 0x13b   :  { %v921_v29 = vand.u32 2147483647, %v920_v54  ;;  %v1034_v54 = vld [vmem:[#allocation11 + $0x48] sm:$0xff] }
 0x13c   :  { %296 = vmatpush.msrb.mxu0 %v279_v2  ;;  %1092 = vmatpush.msrb.mxu2 %v1039_v19 }
 0x13d   :  { %v924_v40 = vmul.f32 %v923_v51, %v921_v29  ;;  %v1033_v51 = vld [vmem:[#allocation11 + $0x40] sm:$0xff]  ;;  %v1032_v29 = vld [vmem:[#allocation11 + $0x38] sm:$0xff] }
 0x13e   :  { %297 = vmatpush.msrb.mxu0 %v278_v44 }
 0x13f   :  { %v925_v61 = vxor.u32 2147483648, %v924_v40 }
 0x140   :  { %298 = vmatpush.msrb.mxu0 %v277_v21 }
 0x141   :  { %v926_v50 = vsel %vm805_vm15, %v925_v61, %v924_v40  ;;  %1222 = vmatmul.msk.f32.gmra.mxu2 %vm160_vm1, %v1042_v15  ;;  %v156_v61 = vperm.slane %v2104_v37, 2 }
 0x142   :  { %v929_v42 = vsel %vm2086_vm2, %v1588_v47, %v926_v50  ;;  %299 = vmatpush.msrb.mxu0 %v276_v39  ;;  %v1038_v47 = vld [vmem:[#allocation11 + $0x68] sm:$0xff] }
 0x143   :  { %v931_v45 = vmul.f32 %v929_v42, %v929_v42  ;;  %1093 = vmatpush.msrb.mxu2 %v1038_v47  ;;  %v1247_v50 = vld [vmem:[%s2151_s9] ss:$0 sm:$0xff]  ;;  %v232_v18 = vadd.f32 %v2095_v1, %v156_v61 }
 0x144   :  { %300 = vmatpush.msrb.mxu0 %v275_v0 }
 0x145   :  { %v932_v6 = vmul.f32 -0.001358992, %v931_v45  ;;  %v939_v9 = vmul.f32 -0.00019511016, %v931_v45  ;;  %1094 = vmatpush.msrb.mxu2 %v1037_v62 }
 0x146   :  { %301 = vmatpush.msrb.mxu0 %v274_v3 }
 0x147   :  { %v933_v57 = vadd.f32 0.041655596, %v932_v6  ;;  %v940_v4 = vadd.f32 0.008332121, %v939_v9  ;;  %1095 = vmatpush.msrb.mxu2 %v1036_v16  ;;  %v1026_v9 = vld [vmem:[#allocation11 + $0x8] sm:$0xff] }
 0x148   :  { %302 = vmatpush.msrb.mxu0 %v273_v36 }
 0x149   :  { %v934_v59 = vmul.f32 %v933_v57, %v931_v45  ;;  %v941_v22 = vmul.f32 %v940_v4, %v931_v45  ;;  %1096 = vmatpush.msrb.mxu2 %v1035_v49  ;;  %v1025_v4 = vld [vmem:[#allocation11] sm:$0xff]  ;;  %v1250_v49 = vld [vmem:[#allocation2] ss:$0 sm:$0xff] }
 0x14a   :  { %303 = vmatpush.msrb.mxu0 %v272_v34  ;;  %1223 = vmatmul.msk.f32.gmra.mxu2 %vm160_vm1, %v1043_v46  ;;  %v1163_v46 = vlaneseq }
 0x14b   :  { %v935_v53 = vadd.f32 -0.4999988, %v934_v59  ;;  %v942_v52 = vadd.f32 -0.16666654, %v941_v22  ;;  %304 = vmatmul.f32.vlgmr.msrb.gmra.mxu0 %v271_v12  ;;  %1097 = vmatpush.msrb.mxu2 %v1034_v54 }
 0x14d   :  { %v936_v26 = vmul.f32 %v935_v53, %v931_v45  ;;  %v943_v30 = vmul.f32 %v942_v52, %v931_v45  ;;  %1098 = vmatpush.msrb.mxu2 %v1033_v51  ;;  %v1027_v45 = vld [vmem:[#allocation11 + $0x10] sm:$0xff] }
 0x14f   :  { %v937_v20 = vadd.f32 1.0, %v936_v26  ;;  %v944_v24 = vadd.f32 1.0, %v943_v30  ;;  %1099 = vmatpush.msrb.mxu2 %v1032_v29  ;;  %v1164_v29 = vand.u32 127, %v1163_v46 }
 0x151   :  { %v945_v5 = vmul.f32 %v944_v24, %v929_v42  ;;  %v953_v48 = vxor.u32 2147483648, %v937_v20  ;;  %1100 = vmatpush.msrb.mxu2 %v1031_v31  ;;  %v1028_v42 = vld [vmem:[#allocation11 + $0x18] sm:$0xff]  ;;  %v1248_v24 = vld [vmem:[%s2154_s12] ss:$0 sm:$0xff]  ;;  %s1447_s12 = smov [#allocation14]  }
 0x152   :  { %1224 = vmatmul.msk.f32.gmra.mxu2 %vm160_vm1, %v1044_v7  ;;  %vm1173_vm1 = vcmask 1041409  }
 0x153   :  { %v950_v23 = vxor.u32 2147483648, %v945_v5  ;;  %v954_v43 = vsel %vm952_vm3, %v953_v48, %v945_v5  ;;  %1101 = vmatpush.msrb.mxu2 %v1030_v17  ;;  %v1249_v48 = vld [vmem:[%s2155_s13] ss:$0 sm:$0xff]  ;;  %s1183_s13 = sshll.u32 %s1447_s12, 4  ;;  %s1184_s13 = int_to_ptr.vmem [resolvable:$true] %s1183_s13 }
 0x155   :  { %v951_v35 = vsel %vm949_vm9, %v937_v20, %v950_v23  ;;  %1102 = vmatpush.msrb.mxu2 %v1029_v58  ;;  %v1166_v58 = vadd.s32 4294967288, %v1164_v29 }
 0x156   :  { %v955_v14 = vsel %vm948_vm5, %v951_v35, %v954_v43 }
 0x157   :  { %v956_v8 = vsel %vm946_vm10, nan, %v955_v14  ;;  %1103 = vmatpush.msrb.mxu2 %v1028_v42 }
 0x158   :  { %1219 = vmatmul.msk.f32.gmra.mxu1 %vm969_vm4, %v956_v8  ;;  %vm1176_vm4 = vcmask 123904  }
 0x159   :  { %1104 = vmatpush.msrb.mxu2 %v1027_v45 }
 0x15b   :  { %1105 = vmatpush.msrb.mxu2 %v1026_v9 }
 0x15d   :  { %1106 = vmatpush.msrb.mxu2 %v1025_v4 }
 0x17c   :  { %v999_v40 = vpop.f32.mrf.mxu1 }
 0x17d   :  { %v1000_v11 = vadd.f32 %v1247_v50, %v999_v40 }
 0x17f   :  { %v1011_v32 = vmax.f32 %v1000_v11, 0.0 }
 0x191   :  { %v1002_v2 = vpop.f32.mrf.mxu1 }
 0x192   :  { %v1003_v25 = vadd.f32 %v1247_v50, %v1002_v2 }
 0x194   :  { %v1012_v59 = vmax.f32 %v1003_v25, 0.0 }
 0x1b0   :  { %v1005_v1 = vpop.f32.mrf.mxu1 }
 0x1b1   :  { %v1006_v21 = vadd.f32 %v1247_v50, %v1005_v1 }
 0x1b3   :  { %v1013_v53 = vmax.f32 %v1006_v21, 0.0 }
 0x1bc   :  { %v1079_v33 = vpop.f32.mrf.mxu2 }
 0x1c4   :  { %v1082_v28 = vpop.f32.mrf.mxu2 }
 0x1c8   :  { %v305_v63 = vpop.f32.mrf.mxu0 }
 0x1c9   :  { %v306_v6 = vadd.f32 %v305_v63, %v232_v18 }
 0x1cb   :  { %v308_v57 = vmax.f32 %v306_v6, 0.0 }
 0x1cd   :  { %v1017_v44 = vperm.slane %v308_v57, 0  ;;  %v1016_v22 = vrot.slane %v308_v57, 1  ;;  %v1085_v0 = vpop.f32.mrf.mxu2 }
 0x1cf   :  { %v1021_v37 = vmul.f32 %v1017_v44, %v1011_v32  ;;  %v1022_v60 = vmul.f32 %v1017_v44, %v1012_v59  ;;  %v1018_v55 = vperm.slane %v1016_v22, 0 }
 0x1d1   :  { %1107 = vmatmul.f32.vlgmr.msrb.gmra.mxu2 %v1021_v37  ;;  %v1023_v39 = vmul.f32 %v1018_v55, %v1013_v53 }
 0x1d5   :  { %v1008_v52 = vpop.f32.mrf.mxu1  ;;  %v1088_v20 = vpop.f32.mrf.mxu2 }
 0x1d6   :  { %v1009_v27 = vadd.f32 %v1247_v50, %v1008_v52 }
 0x1d8   :  { %v1014_v26 = vmax.f32 %v1009_v27, 0.0 }
 0x1d9   :  { %1110 = vmatmul.f32.gmra.mxu2 %v1022_v60 }
 0x1da   :  { %v1024_v30 = vmul.f32 %v1018_v55, %v1014_v26 }
 0x1e1   :  { %1113 = vmatmul.f32.gmra.mxu2 %v1023_v39 }
 0x1e9   :  { %1116 = vmatmul.f32.gmra.mxu2 %v1024_v30 }
 0x254   :  { %v1108_v56 = vpop.f32.mrf.mxu2 }
 0x255   :  { %v1109_v3 = vadd.f32 %v1108_v56, %v1079_v33 }
 0x257   :  { %v1124_v5 = vadd.f32 %v1248_v24, %v1109_v3 }
 0x259   :  { %v1128_v36 = vmax.f32 %v1124_v5, 0.0 }
 0x25b   :  { %v1136_v23 = vmul.f32 %v1249_v48, %v1128_v36 }
 0x25c   :  { %v1111_v43 = vpop.f32.mrf.mxu2 }
 0x25d   :  { %v1112_v12 = vadd.f32 %v1111_v43, %v1082_v28  ;;  %1140 = vadd.xlane.f32.xlu2 %v1136_v23 }
 0x25f   :  { %v1125_v34 = vadd.f32 %v1248_v24, %v1112_v12 }
 0x261   :  { %v1129_v35 = vmax.f32 %v1125_v34, 0.0 }
 0x263   :  { %v1137_v14 = vmul.f32 %v1249_v48, %v1129_v35 }
 0x264   :  { %v1114_v8 = vpop.f32.mrf.mxu2 }
 0x265   :  { %v1115_v10 = vadd.f32 %v1114_v8, %v1085_v0  ;;  %1142 = vadd.xlane.f32.xlu2 %v1137_v14 }
 0x267   :  { %v1126_v38 = vadd.f32 %v1248_v24, %v1115_v10 }
 0x269   :  { %v1130_v13 = vmax.f32 %v1126_v38, 0.0 }
 0x26b   :  { %v1138_v41 = vmul.f32 %v1249_v48, %v1130_v13 }
 0x26c   :  { %v1117_v19 = vpop.f32.mrf.mxu2 }
 0x26d   :  { %v1118_v47 = vadd.f32 %v1117_v19, %v1088_v20  ;;  %1144 = vadd.xlane.f32.xlu0 %v1138_v41 }
 0x26f   :  { %v1127_v62 = vadd.f32 %v1248_v24, %v1118_v47 }
 0x271   :  { %v1131_v15 = vmax.f32 %v1127_v62, 0.0 }
 0x273   :  { %v1139_v16 = vmul.f32 %v1249_v48, %v1131_v15 }
 0x275   :  { %1146 = vadd.xlane.f32.xlu1 %v1139_v16 }
 0x27d   :  { %1152 = vperm.xlu2 %1245, %v1250_v49  }
 0x2d0   :  { %v1141_v54 = vpop.xlane.xlu2 %1140 }
 0x2d8   :  { %v1143_v51 = vpop.xlane.xlu2 %1142 }
 0x2e0   :  { %v1153_v31 = vpop.permute.xlu2 %1152  ;;  %v1145_v40 = vpop.xlane.xlu0 %1144 }
 0x2e1   :  { %v1155_v17 = vadd.f32 %v1153_v31, %v1141_v54  ;;  %v1156_v61 = vadd.f32 %v1153_v31, %v1143_v51  ;;  %v1157_v7 = vadd.f32 %v1153_v31, %v1145_v40 }
 0x2e3   :  { %v1165_v42 = vperm.slane %v1155_v17, %v1164_v29  ;;  %v1167_v18 = vperm.slane %v1156_v61, %v1166_v58  ;;  %v1170_v63 = vperm.slane %v1157_v7, %v1164_v29 }
 0x2e5   :  { %v1169_v9 = vsel %vm1168_vm0, %v1167_v18, %v1165_v42 }
 0x2e8   :  { %v1147_v50 = vpop.xlane.xlu1 %1146 }
 0x2e9   :  { %v1158_v45 = vadd.f32 %v1153_v31, %v1147_v50 }
 0x2eb   :  { %v1171_v11 = vperm.slane %v1158_v45, %v1166_v58 }
 0x2ed   :  { %v1172_v6 = vsel %vm1168_vm0, %v1171_v11, %v1170_v63 }
 0x2ee   :  { %v1174_v2 = vsel %vm1173_vm1, %v1172_v6, %v1169_v9 }
 0x2ef   :  { %1177 = vst.msk [vmem:[#allocation14] sm:$0x3] %vm1176_vm4, %v1174_v2 }
 0x2f0   :  { %1188 = dma.vmem_to_hbm [thread:$0]  %s1184_s13, 32, %s1186_s14, [#allocation5]  }
 0x2f1   :  { %1428 = dma.done.wait [#allocation5], 32  }
 0x2f2   :  { %1429 = vsyncadd [#allocation5], 4294967264 }
 0x2f3   :  { %1193 = vsyncpa [#allocation4], 1 }
 0x2f4   :  { %1194 = vsyncpa [#allocation7], 1 }
 0x2f5   :  { %1195 = vsyncpa [#allocation10], 1 }
 0x2f6   :  { %1196 = vsyncpa [#allocation13], 1 }
 0x2f7   :  { %1197 = vsyncpa [#allocation5], 1 }

</bundles_post_ra>
